<compile_context>
chip_gen: v7x
topology: tpu7x:2x2x1
jax: 0.10.0
libtpu: 0.0.40
codegen_flags: <defaults>
</compile_context>

<pallas_src>
import math

import jax
import jax.numpy as jnp
from jax import lax
from jax.experimental import pallas as pl
from jax.experimental.pallas import tpu as pltpu

# ----------------------------- model sizes (small stand-ins) -----------------------------
B = 2                      # batch
C_IN = 4                   # input channels
IMG = 16                   # spatial H = W
HW = IMG * IMG             # spatial positions per image
CNN_FEATS = 64             # stand-in for resnet50's 2048
PATCH = 4                  # ViT patch size
VIT_D = 32                 # stand-in for vit_base's 768 (= vit_features)
N_HEADS = 4
HEAD_D = VIT_D // N_HEADS  # 8
MLP_D = 2 * VIT_D
N_PATCH = (IMG // PATCH) ** 2   # 16
N_TOK = N_PATCH + 1             # 17 (patches + CLS)
N_PAD = 24                      # token rows padded to a sublane multiple; extra keys masked
CLS_HID = 64                    # stand-in for classifier hidden 512
NUM_CLASSES = 10
CNN_CHUNK = 128                 # row chunk of the conv matmul (keeps vreg pressure low)
LN_EPS = 1e-6
ATTN_SCALE = 1.0 / math.sqrt(HEAD_D)
NEG_INF = -1e30


# ----------------------------- fused forward kernel -----------------------------
def _fused_kernel(
    im2col_ref, conv_w_ref, conv_b_ref,
    patches_ref, patch_w_ref, patch_b_ref,
    cls_pos0_ref, pos_rest_ref,
    ln1_g_ref, ln1_b_ref, qkv_w_ref, qkv_b_ref, proj_w_ref, proj_b_ref,
    ln2_g_ref, ln2_b_ref, fc1_w_ref, fc1_b_ref, fc2_w_ref, fc2_b_ref,
    lnf_g_ref, lnf_b_ref,
    cls1_w_ref, cls1_b_ref, cls2_w_ref, cls2_b_ref,
    out_ref, x_scr):
  """One grid step == one batch element. Everything stays in vregs / VMEM."""
  f32 = jnp.float32

  def mm(a, w):  # bf16 operands, f32 accumulation on the MXU
    return jnp.dot(a.astype(jnp.bfloat16), w, preferred_element_type=f32)

  def layer_norm(x, g_ref, b_ref):
    mu = jnp.mean(x, axis=-1, keepdims=True)
    var = jnp.mean(jnp.square(x - mu), axis=-1, keepdims=True)
    return (x - mu) * lax.rsqrt(var + LN_EPS) * g_ref[...] + b_ref[...]

  # -------- CNN path: conv-as-matmul + ReLU + global-avg-pool, fused in VMEM --------
  gap = jnp.zeros((1, CNN_FEATS), f32)
  for c in range(HW // CNN_CHUNK):
    rows = im2col_ref[0, c * CNN_CHUNK:(c + 1) * CNN_CHUNK, :]
    act = jnp.maximum(mm(rows, conv_w_ref[...]) + conv_b_ref[...], 0.0)
    gap = gap + jnp.sum(act, axis=0, keepdims=True)
  cnn_feat = gap * (1.0 / HW)                                    # (1, CNN_FEATS)

  # -------- ViT path --------
  patch_emb = mm(patches_ref[0], patch_w_ref[...]) + patch_b_ref[...]   # (N_PATCH, D)
  # assemble padded token matrix in VMEM scratch: rows 0..15 patches, row 16 CLS, rest 0
  x_scr[...] = jnp.zeros_like(x_scr)
  x_scr[0:N_PATCH, :] = patch_emb + pos_rest_ref[...]
  x_scr[N_PATCH:N_PATCH + 1, :] = cls_pos0_ref[...]
  x = x_scr[...]                                                 # (N_PAD, D)

  # --- attention sub-block (pre-norm); heads are static lane slices of the fused qkv ---
  xn = layer_norm(x, ln1_g_ref, ln1_b_ref)
  qkv = mm(xn, qkv_w_ref[...]) + qkv_b_ref[...]                  # (N_PAD, 3*D)
  key_valid = lax.broadcasted_iota(jnp.int32, (N_PAD, N_PAD), 1) < N_TOK
  attn_out = jnp.zeros((N_PAD, VIT_D), f32)
  for hd in range(N_HEADS):
    lo = hd * HEAD_D
    q = qkv[:, lo:lo + HEAD_D]
    k = qkv[:, VIT_D + lo:VIT_D + lo + HEAD_D]
    v = qkv[:, 2 * VIT_D + lo:2 * VIT_D + lo + HEAD_D]
    s = lax.dot_general(q, k, (((1,), (1,)), ((), ())),
                        preferred_element_type=f32) * ATTN_SCALE  # (N_PAD, N_PAD)
    s = jnp.where(key_valid, s, NEG_INF)                          # mask padded keys
    s = s - jnp.max(s, axis=-1, keepdims=True)
    p = jnp.exp(s)
    p = p * pl.reciprocal(jnp.sum(p, axis=-1, keepdims=True), approx=True)
    o = jnp.dot(p, v, preferred_element_type=f32)                 # (N_PAD, HEAD_D)
    # fold the output projection in per head: avoids re-assembling a (N_PAD, D) tensor
    attn_out = attn_out + jnp.dot(o, proj_w_ref[lo:lo + HEAD_D, :],
                                  preferred_element_type=f32)
  x = x + attn_out + proj_b_ref[...]

  # --- MLP sub-block (pre-norm) ---
  xn = layer_norm(x, ln2_g_ref, ln2_b_ref)
  # TODO(synk): PyTorch nn.GELU defaults to exact erf GELU; tanh approximation used here.
  h1 = jax.nn.gelu(mm(xn, fc1_w_ref[...]) + fc1_b_ref[...], approximate=True)
  x = x + mm(h1, fc2_w_ref[...]) + fc2_b_ref[...]

  # --- final norm; ViT feature = CLS token row ---
  x = layer_norm(x, lnf_g_ref, lnf_b_ref)
  vit_feat = x[N_PATCH:N_PATCH + 1, :]                            # (1, VIT_D)

  # -------- fusion ('concat') + classifier head --------
  # concat(cnn, vit) @ W1  ==  cnn @ W1[:CNN_FEATS]  +  vit @ W1[CNN_FEATS:]
  hidden = (mm(cnn_feat, cls1_w_ref[0:CNN_FEATS, :]) +
            mm(vit_feat, cls1_w_ref[CNN_FEATS:CNN_FEATS + VIT_D, :]) +
            cls1_b_ref[...])
  hidden = jnp.maximum(hidden, 0.0)
  # nn.Dropout(0.3) is identity at inference time (eval mode).
  out_ref[0] = mm(hidden, cls2_w_ref[...]) + cls2_b_ref[...]      # (1, NUM_CLASSES)


def _fused_forward(im2col, patches, cls_pos0, pos_rest, p):
  n_b = im2col.shape[0]
  args = (
      im2col, p["conv_w"], p["conv_b"].reshape(1, -1),
      patches, p["patch_w"], p["patch_b"].reshape(1, -1),
      cls_pos0, pos_rest,
      p["ln1_g"].reshape(1, -1), p["ln1_b"].reshape(1, -1),
      p["qkv_w"], p["qkv_b"].reshape(1, -1),
      p["proj_w"], p["proj_b"].reshape(1, -1),
      p["ln2_g"].reshape(1, -1), p["ln2_b"].reshape(1, -1),
      p["fc1_w"], p["fc1_b"].reshape(1, -1),
      p["fc2_w"], p["fc2_b"].reshape(1, -1),
      p["lnf_g"].reshape(1, -1), p["lnf_b"].reshape(1, -1),
      p["cls1_w"], p["cls1_b"].reshape(1, -1),
      p["cls2_w"], p["cls2_b"].reshape(1, -1),
  )
  in_specs = []
  for a in args:
    if a.ndim == 3:   # per-batch activations: one batch element per grid step
      in_specs.append(pl.BlockSpec((1,) + a.shape[1:], lambda i: (i, 0, 0)))
    else:             # weights / biases: same block every step (not re-fetched)
      in_specs.append(pl.BlockSpec(a.shape, lambda i: (0, 0)))

  out = pl.pallas_call(
      _fused_kernel,
      out_shape=jax.ShapeDtypeStruct((n_b, 1, NUM_CLASSES), jnp.float32),
      grid=(n_b,),
      in_specs=in_specs,
      out_specs=pl.BlockSpec((1, 1, NUM_CLASSES), lambda i: (i, 0, 0)),
      scratch_shapes=[pltpu.VMEM((N_PAD, VIT_D), jnp.float32)],
      compiler_params=pltpu.CompilerParams(
          # batch axis is independent -> shards across v7x's 2 TensorCores
          dimension_semantics=("parallel",)),
  )(*args)
  return out.reshape(n_b, NUM_CLASSES)


# ----------------------------- parameter init -----------------------------
def init_params(key):
  ks = iter(jax.random.split(key, 16))

  def wmat(shape, dtype=jnp.bfloat16):
    fan_in = shape[0]
    w = (1.0 / math.sqrt(fan_in)) * jax.random.normal(next(ks), shape, jnp.float32)
    return w.astype(dtype)

  p = {}
  # CNN stand-in: 3x3 conv, C_IN -> CNN_FEATS (as im2col matmul weight)
  p["conv_w"] = wmat((9 * C_IN, CNN_FEATS))
  p["conv_b"] = jnp.zeros((CNN_FEATS,), jnp.float32)
  # ViT stand-in
  p["patch_w"] = wmat((PATCH * PATCH * C_IN, VIT_D))
  p["patch_b"] = jnp.zeros((VIT_D,), jnp.float32)
  p["cls"] = 0.02 * jax.random.normal(next(ks), (1, 1, VIT_D), jnp.float32)
  p["pos"] = 0.02 * jax.random.normal(next(ks), (1, N_TOK, VIT_D), jnp.float32)
  p["ln1_g"] = jnp.ones((VIT_D,), jnp.float32)
  p["ln1_b"] = jnp.zeros((VIT_D,), jnp.float32)
  p["qkv_w"] = wmat((VIT_D, 3 * VIT_D))
  p["qkv_b"] = jnp.zeros((3 * VIT_D,), jnp.float32)
  p["proj_w"] = wmat((VIT_D, VIT_D), jnp.float32)   # f32: sliced per-head at 8-row offsets
  p["proj_b"] = jnp.zeros((VIT_D,), jnp.float32)
  p["ln2_g"] = jnp.ones((VIT_D,), jnp.float32)
  p["ln2_b"] = jnp.zeros((VIT_D,), jnp.float32)
  p["fc1_w"] = wmat((VIT_D, MLP_D))
  p["fc1_b"] = jnp.zeros((MLP_D,), jnp.float32)
  p["fc2_w"] = wmat((MLP_D, VIT_D))
  p["fc2_b"] = jnp.zeros((VIT_D,), jnp.float32)
  p["lnf_g"] = jnp.ones((VIT_D,), jnp.float32)
  p["lnf_b"] = jnp.zeros((VIT_D,), jnp.float32)
  # fusion classifier (fusion_method='concat' -> input dim = CNN_FEATS + VIT_D)
  p["cls1_w"] = wmat((CNN_FEATS + VIT_D, CLS_HID))
  p["cls1_b"] = jnp.zeros((CLS_HID,), jnp.float32)
  p["cls2_w"] = wmat((CLS_HID, NUM_CLASSES))
  p["cls2_b"] = jnp.zeros((NUM_CLASSES,), jnp.float32)
  return p


# ----------------------------- public forward -----------------------------
def parallel_cnn_vit_forward(x_nchw, params):
  # layout: NCHW (PyTorch) -> NHWC so channels sit on the TPU lane axis.
  x = jnp.transpose(x_nchw, (0, 2, 3, 1)).astype(jnp.float32)
  b, h, w, c = x.shape

  # CNN glue: im2col for a 3x3 / pad=1 / stride=1 conv.
  # TODO(synk): at production ResNet sizes this im2col moves inside the kernel
  # (shifted-window matmul accumulation) to avoid the 9x HBM expansion.
  xp = jnp.pad(x, ((0, 0), (1, 1), (1, 1), (0, 0)))
  cols = [xp[:, dy:dy + h, dx:dx + w, :] for dy in range(3) for dx in range(3)]
  im2col = jnp.concatenate(cols, axis=-1).reshape(b, h * w, 9 * c)

  # ViT glue: patchify + fold CLS into the positional table.
  hp, wp = h // PATCH, w // PATCH
  patches = x.reshape(b, hp, PATCH, wp, PATCH, c)
  patches = patches.transpose(0, 1, 3, 2, 4, 5).reshape(b, hp * wp, PATCH * PATCH * c)
  cls_pos0 = params["cls"][:, 0, :] + params["pos"][:, 0, :]   # (1, D)   CLS + its pos
  pos_rest = params["pos"][0, 1:, :]                           # (N_PATCH, D)

  return _fused_forward(im2col, patches, cls_pos0, pos_rest, params)


if __name__ == "__main__":
  x = jax.random.normal(jax.random.PRNGKey(0), (B, C_IN, IMG, IMG), jnp.float32)  # NCHW
  params = init_params(jax.random.PRNGKey(1))
  fwd = jax.jit(parallel_cnn_vit_forward)
  logits = fwd(x, params)
  jax.block_until_ready(logits)
  assert logits.shape == (B, NUM_CLASSES) and logits.dtype == jnp.float32
  assert bool(jnp.all(jnp.isfinite(logits)))
  print("KERNEL_OK")
</pallas_src>

<mosaic_0001>
module attributes {stable_mosaic.version = 11 : i64} {
  func.func @_fused_kernel(%arg0: i32, %arg1: memref<1x256x36xf32, #tpu.memory_space<vmem>>, %arg2: memref<36x64xbf16, #tpu.memory_space<vmem>>, %arg3: memref<1x64xf32, #tpu.memory_space<vmem>>, %arg4: memref<1x16x64xf32, #tpu.memory_space<vmem>>, %arg5: memref<64x32xbf16, #tpu.memory_space<vmem>>, %arg6: memref<1x32xf32, #tpu.memory_space<vmem>>, %arg7: memref<1x32xf32, #tpu.memory_space<vmem>>, %arg8: memref<16x32xf32, #tpu.memory_space<vmem>>, %arg9: memref<1x32xf32, #tpu.memory_space<vmem>>, %arg10: memref<1x32xf32, #tpu.memory_space<vmem>>, %arg11: memref<32x96xbf16, #tpu.memory_space<vmem>>, %arg12: memref<1x96xf32, #tpu.memory_space<vmem>>, %arg13: memref<32x32xf32, #tpu.memory_space<vmem>>, %arg14: memref<1x32xf32, #tpu.memory_space<vmem>>, %arg15: memref<1x32xf32, #tpu.memory_space<vmem>>, %arg16: memref<1x32xf32, #tpu.memory_space<vmem>>, %arg17: memref<32x64xbf16, #tpu.memory_space<vmem>>, %arg18: memref<1x64xf32, #tpu.memory_space<vmem>>, %arg19: memref<64x32xbf16, #tpu.memory_space<vmem>>, %arg20: memref<1x32xf32, #tpu.memory_space<vmem>>, %arg21: memref<1x32xf32, #tpu.memory_space<vmem>>, %arg22: memref<1x32xf32, #tpu.memory_space<vmem>>, %arg23: memref<96x64xbf16, #tpu.memory_space<vmem>>, %arg24: memref<1x64xf32, #tpu.memory_space<vmem>>, %arg25: memref<64x10xbf16, #tpu.memory_space<vmem>>, %arg26: memref<1x10xf32, #tpu.memory_space<vmem>>, %arg27: memref<1x1x10xf32, #tpu.memory_space<vmem>>, %arg28: memref<24x32xf32, #tpu.memory_space<vmem>>) attributes {dimension_semantics = [#tpu.dimension_semantics<parallel>], iteration_bounds = array<i64: 2>, scalar_prefetch = 0 : i64, scratch_operands = 1 : i64, tpu.core_type = #tpu.core_type<tc>, window_params = [{transform_indices = @transform_0, window_bounds = array<i64: 1, 256, 36>}, {pipeline_mode = #tpu.pipeline_mode<synchronous>, transform_indices = @transform_1, window_bounds = array<i64: 36, 64>}, {pipeline_mode = #tpu.pipeline_mode<synchronous>, transform_indices = @transform_2, window_bounds = array<i64: 1, 64>}, {transform_indices = @transform_3, window_bounds = array<i64: 1, 16, 64>}, {pipeline_mode = #tpu.pipeline_mode<synchronous>, transform_indices = @transform_4, window_bounds = array<i64: 64, 32>}, {pipeline_mode = #tpu.pipeline_mode<synchronous>, transform_indices = @transform_5, window_bounds = array<i64: 1, 32>}, {pipeline_mode = #tpu.pipeline_mode<synchronous>, transform_indices = @transform_6, window_bounds = array<i64: 1, 32>}, {pipeline_mode = #tpu.pipeline_mode<synchronous>, transform_indices = @transform_7, window_bounds = array<i64: 16, 32>}, {pipeline_mode = #tpu.pipeline_mode<synchronous>, transform_indices = @transform_8, window_bounds = array<i64: 1, 32>}, {pipeline_mode = #tpu.pipeline_mode<synchronous>, transform_indices = @transform_9, window_bounds = array<i64: 1, 32>}, {pipeline_mode = #tpu.pipeline_mode<synchronous>, transform_indices = @transform_10, window_bounds = array<i64: 32, 96>}, {pipeline_mode = #tpu.pipeline_mode<synchronous>, transform_indices = @transform_11, window_bounds = array<i64: 1, 96>}, {pipeline_mode = #tpu.pipeline_mode<synchronous>, transform_indices = @transform_12, window_bounds = array<i64: 32, 32>}, {pipeline_mode = #tpu.pipeline_mode<synchronous>, transform_indices = @transform_13, window_bounds = array<i64: 1, 32>}, {pipeline_mode = #tpu.pipeline_mode<synchronous>, transform_indices = @transform_14, window_bounds = array<i64: 1, 32>}, {pipeline_mode = #tpu.pipeline_mode<synchronous>, transform_indices = @transform_15, window_bounds = array<i64: 1, 32>}, {pipeline_mode = #tpu.pipeline_mode<synchronous>, transform_indices = @transform_16, window_bounds = array<i64: 32, 64>}, {pipeline_mode = #tpu.pipeline_mode<synchronous>, transform_indices = @transform_17, window_bounds = array<i64: 1, 64>}, {pipeline_mode = #tpu.pipeline_mode<synchronous>, transform_indices = @transform_18, window_bounds = array<i64: 64, 32>}, {pipeline_mode = #tpu.pipeline_mode<synchronous>, transform_indices = @transform_19, window_bounds = array<i64: 1, 32>}, {pipeline_mode = #tpu.pipeline_mode<synchronous>, transform_indices = @transform_20, window_bounds = array<i64: 1, 32>}, {pipeline_mode = #tpu.pipeline_mode<synchronous>, transform_indices = @transform_21, window_bounds = array<i64: 1, 32>}, {pipeline_mode = #tpu.pipeline_mode<synchronous>, transform_indices = @transform_22, window_bounds = array<i64: 96, 64>}, {pipeline_mode = #tpu.pipeline_mode<synchronous>, transform_indices = @transform_23, window_bounds = array<i64: 1, 64>}, {pipeline_mode = #tpu.pipeline_mode<synchronous>, transform_indices = @transform_24, window_bounds = array<i64: 64, 10>}, {pipeline_mode = #tpu.pipeline_mode<synchronous>, transform_indices = @transform_25, window_bounds = array<i64: 1, 10>}, {transform_indices = @transform_26, window_bounds = array<i64: 1, 1, 10>}]} {
    %cst = arith.constant 0.000000e+00 : f32
    %0 = vector.broadcast %cst : f32 to vector<1x64xf32>
    %c0 = arith.constant 0 : index
    %c0_0 = arith.constant 0 : index
    %c0_1 = arith.constant 0 : index
    %1 = vector.load %arg1[%c0, %c0_0, %c0_1] : memref<1x256x36xf32, #tpu.memory_space<vmem>>, vector<1x128x36xf32>
    %2 = vector.shape_cast %1 : vector<1x128x36xf32> to vector<128x36xf32>
    %c0_2 = arith.constant 0 : index
    %c0_3 = arith.constant 0 : index
    %3 = vector.load %arg2[%c0_2, %c0_3] : memref<36x64xbf16, #tpu.memory_space<vmem>>, vector<36x64xbf16>
    %4 = arith.truncf %2 : vector<128x36xf32> to vector<128x36xbf16>
    %cst_4 = arith.constant dense<0.000000e+00> : vector<128x64xf32>
    %5 = tpu.matmul %4, %3, %cst_4 {dimension_numbers = #tpu.dot_dimension_numbers<[1], [0], [0], [1], [0, 0, 1, 1], [], []>} : vector<128x36xbf16>, vector<36x64xbf16>, vector<128x64xf32> -> vector<128x64xf32>
    %c0_5 = arith.constant 0 : index
    %c0_6 = arith.constant 0 : index
    %6 = vector.load %arg3[%c0_5, %c0_6] : memref<1x64xf32, #tpu.memory_space<vmem>>, vector<1x64xf32>
    %7 = vector.broadcast %6 : vector<1x64xf32> to vector<128x64xf32>
    %8 = arith.addf %5, %7 : vector<128x64xf32>
    %cst_7 = arith.constant 0.000000e+00 : f32
    %9 = vector.broadcast %cst_7 : f32 to vector<128x64xf32>
    %10 = arith.maximumf %8, %9 : vector<128x64xf32>
    %cst_8 = arith.constant dense<0.000000e+00> : vector<64xf32>
    %11 = vector.multi_reduction <add>, %10, %cst_8 [0] : vector<128x64xf32> to vector<64xf32>
    %12 = vector.shape_cast %11 : vector<64xf32> to vector<1x64xf32>
    %13 = arith.addf %0, %12 : vector<1x64xf32>
    %c0_9 = arith.constant 0 : index
    %c128 = arith.constant 128 : index
    %c0_10 = arith.constant 0 : index
    %14 = vector.load %arg1[%c0_9, %c128, %c0_10] : memref<1x256x36xf32, #tpu.memory_space<vmem>>, vector<1x128x36xf32>
    %15 = vector.shape_cast %14 : vector<1x128x36xf32> to vector<128x36xf32>
    %c0_11 = arith.constant 0 : index
    %c0_12 = arith.constant 0 : index
    %16 = vector.load %arg2[%c0_11, %c0_12] : memref<36x64xbf16, #tpu.memory_space<vmem>>, vector<36x64xbf16>
    %17 = arith.truncf %15 : vector<128x36xf32> to vector<128x36xbf16>
    %cst_13 = arith.constant dense<0.000000e+00> : vector<128x64xf32>
    %18 = tpu.matmul %17, %16, %cst_13 {dimension_numbers = #tpu.dot_dimension_numbers<[1], [0], [0], [1], [0, 0, 1, 1], [], []>} : vector<128x36xbf16>, vector<36x64xbf16>, vector<128x64xf32> -> vector<128x64xf32>
    %c0_14 = arith.constant 0 : index
    %c0_15 = arith.constant 0 : index
    %19 = vector.load %arg3[%c0_14, %c0_15] : memref<1x64xf32, #tpu.memory_space<vmem>>, vector<1x64xf32>
    %20 = vector.broadcast %19 : vector<1x64xf32> to vector<128x64xf32>
    %21 = arith.addf %18, %20 : vector<128x64xf32>
    %cst_16 = arith.constant 0.000000e+00 : f32
    %22 = vector.broadcast %cst_16 : f32 to vector<128x64xf32>
    %23 = arith.maximumf %21, %22 : vector<128x64xf32>
    %cst_17 = arith.constant dense<0.000000e+00> : vector<64xf32>
    %24 = vector.multi_reduction <add>, %23, %cst_17 [0] : vector<128x64xf32> to vector<64xf32>
    %25 = vector.shape_cast %24 : vector<64xf32> to vector<1x64xf32>
    %26 = arith.addf %13, %25 : vector<1x64xf32>
    %cst_18 = arith.constant 3.906250e-03 : f32
    %27 = vector.broadcast %cst_18 : f32 to vector<1x64xf32>
    %28 = arith.mulf %26, %27 : vector<1x64xf32>
    %c0_19 = arith.constant 0 : index
    %c0_20 = arith.constant 0 : index
    %c0_21 = arith.constant 0 : index
    %29 = vector.load %arg4[%c0_19, %c0_20, %c0_21] : memref<1x16x64xf32, #tpu.memory_space<vmem>>, vector<1x16x64xf32>
    %30 = vector.shape_cast %29 : vector<1x16x64xf32> to vector<16x64xf32>
    %c0_22 = arith.constant 0 : index
    %c0_23 = arith.constant 0 : index
    %31 = vector.load %arg5[%c0_22, %c0_23] : memref<64x32xbf16, #tpu.memory_space<vmem>>, vector<64x32xbf16>
    %32 = arith.truncf %30 : vector<16x64xf32> to vector<16x64xbf16>
    %cst_24 = arith.constant dense<0.000000e+00> : vector<16x32xf32>
    %33 = tpu.matmul %32, %31, %cst_24 {dimension_numbers = #tpu.dot_dimension_numbers<[1], [0], [0], [1], [0, 0, 1, 1], [], []>} : vector<16x64xbf16>, vector<64x32xbf16>, vector<16x32xf32> -> vector<16x32xf32>
    %c0_25 = arith.constant 0 : index
    %c0_26 = arith.constant 0 : index
    %34 = vector.load %arg6[%c0_25, %c0_26] : memref<1x32xf32, #tpu.memory_space<vmem>>, vector<1x32xf32>
    %35 = vector.broadcast %34 : vector<1x32xf32> to vector<16x32xf32>
    %36 = arith.addf %33, %35 : vector<16x32xf32>
    %cst_27 = arith.constant 0.000000e+00 : f32
    %37 = vector.broadcast %cst_27 : f32 to vector<24x32xf32>
    %c0_28 = arith.constant 0 : index
    %c0_29 = arith.constant 0 : index
    %38 = vector.load %arg28[%c0_28, %c0_29] : memref<24x32xf32, #tpu.memory_space<vmem>>, vector<24x32xf32>
    tpu.vector_store %arg28[%c0_28, %c0_29], %37 {strides = array<i32>} : memref<24x32xf32, #tpu.memory_space<vmem>>, vector<24x32xf32>,
    %c0_30 = arith.constant 0 : index
    %c0_31 = arith.constant 0 : index
    %39 = vector.load %arg8[%c0_30, %c0_31] : memref<16x32xf32, #tpu.memory_space<vmem>>, vector<16x32xf32>
    %40 = arith.addf %36, %39 : vector<16x32xf32>
    %c0_32 = arith.constant 0 : index
    %c0_33 = arith.constant 0 : index
    %41 = vector.load %arg28[%c0_32, %c0_33] : memref<24x32xf32, #tpu.memory_space<vmem>>, vector<16x32xf32>
    tpu.vector_store %arg28[%c0_32, %c0_33], %40 {strides = array<i32>} : memref<24x32xf32, #tpu.memory_space<vmem>>, vector<16x32xf32>,
    %c0_34 = arith.constant 0 : index
    %c0_35 = arith.constant 0 : index
    %42 = vector.load %arg7[%c0_34, %c0_35] : memref<1x32xf32, #tpu.memory_space<vmem>>, vector<1x32xf32>
    %c16 = arith.constant 16 : index
    %c0_36 = arith.constant 0 : index
    %43 = vector.load %arg28[%c16, %c0_36] : memref<24x32xf32, #tpu.memory_space<vmem>>, vector<1x32xf32>
    tpu.vector_store %arg28[%c16, %c0_36], %42 {strides = array<i32>} : memref<24x32xf32, #tpu.memory_space<vmem>>, vector<1x32xf32>,
    %c0_37 = arith.constant 0 : index
    %c0_38 = arith.constant 0 : index
    %44 = vector.load %arg28[%c0_37, %c0_38] : memref<24x32xf32, #tpu.memory_space<vmem>>, vector<24x32xf32>
    %cst_39 = arith.constant dense<0.000000e+00> : vector<24xf32>
    %45 = vector.multi_reduction <add>, %44, %cst_39 [1] : vector<24x32xf32> to vector<24xf32>
    %46 = vector.shape_cast %45 : vector<24xf32> to vector<24x1xf32>
    %cst_40 = arith.constant 3.200000e+01 : f32
    %47 = vector.broadcast %cst_40 : f32 to vector<24x1xf32>
    %48 = arith.divf %46, %47 : vector<24x1xf32>
    %49 = vector.broadcast %48 : vector<24x1xf32> to vector<24x32xf32>
    %50 = arith.subf %44, %49 : vector<24x32xf32>
    %51 = arith.mulf %50, %50 : vector<24x32xf32>
    %cst_41 = arith.constant dense<0.000000e+00> : vector<24xf32>
    %52 = vector.multi_reduction <add>, %51, %cst_41 [1] : vector<24x32xf32> to vector<24xf32>
    %53 = vector.shape_cast %52 : vector<24xf32> to vector<24x1xf32>
    %cst_42 = arith.constant 3.200000e+01 : f32
    %54 = vector.broadcast %cst_42 : f32 to vector<24x1xf32>
    %55 = arith.divf %53, %54 : vector<24x1xf32>
    %56 = vector.broadcast %48 : vector<24x1xf32> to vector<24x32xf32>
    %57 = arith.subf %44, %56 : vector<24x32xf32>
    %cst_43 = arith.constant 9.99999997E-7 : f32
    %58 = vector.broadcast %cst_43 : f32 to vector<24x1xf32>
    %59 = arith.addf %55, %58 : vector<24x1xf32>
    %60 = math.rsqrt %59 : vector<24x1xf32>
    %61 = vector.broadcast %60 : vector<24x1xf32> to vector<24x32xf32>
    %62 = arith.mulf %57, %61 : vector<24x32xf32>
    %c0_44 = arith.constant 0 : index
    %c0_45 = arith.constant 0 : index
    %63 = vector.load %arg9[%c0_44, %c0_45] : memref<1x32xf32, #tpu.memory_space<vmem>>, vector<1x32xf32>
    %64 = vector.broadcast %63 : vector<1x32xf32> to vector<24x32xf32>
    %65 = arith.mulf %62, %64 : vector<24x32xf32>
    %c0_46 = arith.constant 0 : index
    %c0_47 = arith.constant 0 : index
    %66 = vector.load %arg10[%c0_46, %c0_47] : memref<1x32xf32, #tpu.memory_space<vmem>>, vector<1x32xf32>
    %67 = vector.broadcast %66 : vector<1x32xf32> to vector<24x32xf32>
    %68 = arith.addf %65, %67 : vector<24x32xf32>
    %c0_48 = arith.constant 0 : index
    %c0_49 = arith.constant 0 : index
    %69 = vector.load %arg11[%c0_48, %c0_49] : memref<32x96xbf16, #tpu.memory_space<vmem>>, vector<32x96xbf16>
    %70 = arith.truncf %68 : vector<24x32xf32> to vector<24x32xbf16>
    %cst_50 = arith.constant dense<0.000000e+00> : vector<24x96xf32>
    %71 = tpu.matmul %70, %69, %cst_50 {dimension_numbers = #tpu.dot_dimension_numbers<[1], [0], [0], [1], [0, 0, 1, 1], [], []>} : vector<24x32xbf16>, vector<32x96xbf16>, vector<24x96xf32> -> vector<24x96xf32>
    %c0_51 = arith.constant 0 : index
    %c0_52 = arith.constant 0 : index
    %72 = vector.load %arg12[%c0_51, %c0_52] : memref<1x96xf32, #tpu.memory_space<vmem>>, vector<1x96xf32>
    %73 = vector.broadcast %72 : vector<1x96xf32> to vector<24x96xf32>
    %74 = arith.addf %71, %73 : vector<24x96xf32>
    %75 = tpu.iota {dimensions = array<i32: 1>} : vector<24x24xi32>
    %c17_i32 = arith.constant 17 : i32
    %76 = vector.broadcast %c17_i32 : i32 to vector<24x24xi32>
    %77 = arith.cmpi slt, %75, %76 : vector<24x24xi32>
    %cst_53 = arith.constant 0.000000e+00 : f32
    %78 = vector.broadcast %cst_53 : f32 to vector<24x32xf32>
    %79 = vector.extract_strided_slice %74 {offsets = [0, 0], sizes = [24, 8], strides = [1, 1]} : vector<24x96xf32> to vector<24x8xf32>
    %80 = vector.extract_strided_slice %74 {offsets = [0, 32], sizes = [24, 8], strides = [1, 1]} : vector<24x96xf32> to vector<24x8xf32>
    %81 = vector.extract_strided_slice %74 {offsets = [0, 64], sizes = [24, 8], strides = [1, 1]} : vector<24x96xf32> to vector<24x8xf32>
    %cst_54 = arith.constant dense<0.000000e+00> : vector<24x24xf32>
    %82 = tpu.matmul %79, %80, %cst_54 {dimension_numbers = #tpu.dot_dimension_numbers<[1], [1], [0], [0], [0, 0, 1, 0], [], []>} : vector<24x8xf32>, vector<24x8xf32>, vector<24x24xf32> -> vector<24x24xf32>
    %cst_55 = arith.constant 0.353553385 : f32
    %83 = vector.broadcast %cst_55 : f32 to vector<24x24xf32>
    %84 = arith.mulf %82, %83 : vector<24x24xf32>
    %cst_56 = arith.constant -1.000000e+30 : f32
    %85 = vector.broadcast %cst_56 : f32 to vector<24x24xf32>
    %86 = arith.select %77, %84, %85 : vector<24x24xi1>, vector<24x24xf32>
    %cst_57 = arith.constant dense<0xFF800000> : vector<24xf32>
    %87 = vector.multi_reduction <maximumf>, %86, %cst_57 [1] : vector<24x24xf32> to vector<24xf32>
    %88 = vector.shape_cast %87 : vector<24xf32> to vector<24x1xf32>
    %89 = vector.broadcast %88 : vector<24x1xf32> to vector<24x24xf32>
    %90 = arith.subf %86, %89 : vector<24x24xf32>
    %91 = math.exp %90 : vector<24x24xf32>
    %cst_58 = arith.constant dense<0.000000e+00> : vector<24xf32>
    %92 = vector.multi_reduction <add>, %91, %cst_58 [1] : vector<24x24xf32> to vector<24xf32>
    %93 = vector.shape_cast %92 : vector<24xf32> to vector<24x1xf32>
    %94 = tpu.reciprocal %93 {approx = true} : vector<24x1xf32> -> vector<24x1xf32>
    %95 = vector.broadcast %94 : vector<24x1xf32> to vector<24x24xf32>
    %96 = arith.mulf %91, %95 : vector<24x24xf32>
    %cst_59 = arith.constant dense<0.000000e+00> : vector<24x8xf32>
    %97 = tpu.matmul %96, %81, %cst_59 {dimension_numbers = #tpu.dot_dimension_numbers<[1], [0], [0], [1], [0, 0, 1, 1], [], []>} : vector<24x24xf32>, vector<24x8xf32>, vector<24x8xf32> -> vector<24x8xf32>
    %c0_60 = arith.constant 0 : index
    %c0_61 = arith.constant 0 : index
    %98 = vector.load %arg13[%c0_60, %c0_61] : memref<32x32xf32, #tpu.memory_space<vmem>>, vector<8x32xf32>
    %cst_62 = arith.constant dense<0.000000e+00> : vector<24x32xf32>
    %99 = tpu.matmul %97, %98, %cst_62 {dimension_numbers = #tpu.dot_dimension_numbers<[1], [0], [0], [1], [0, 0, 1, 1], [], []>} : vector<24x8xf32>, vector<8x32xf32>, vector<24x32xf32> -> vector<24x32xf32>
    %100 = arith.addf %78, %99 : vector<24x32xf32>
    %101 = vector.extract_strided_slice %74 {offsets = [0, 8], sizes = [24, 8], strides = [1, 1]} : vector<24x96xf32> to vector<24x8xf32>
    %102 = vector.extract_strided_slice %74 {offsets = [0, 40], sizes = [24, 8], strides = [1, 1]} : vector<24x96xf32> to vector<24x8xf32>
    %103 = vector.extract_strided_slice %74 {offsets = [0, 72], sizes = [24, 8], strides = [1, 1]} : vector<24x96xf32> to vector<24x8xf32>
    %cst_63 = arith.constant dense<0.000000e+00> : vector<24x24xf32>
    %104 = tpu.matmul %101, %102, %cst_63 {dimension_numbers = #tpu.dot_dimension_numbers<[1], [1], [0], [0], [0, 0, 1, 0], [], []>} : vector<24x8xf32>, vector<24x8xf32>, vector<24x24xf32> -> vector<24x24xf32>
    %cst_64 = arith.constant 0.353553385 : f32
    %105 = vector.broadcast %cst_64 : f32 to vector<24x24xf32>
    %106 = arith.mulf %104, %105 : vector<24x24xf32>
    %cst_65 = arith.constant -1.000000e+30 : f32
    %107 = vector.broadcast %cst_65 : f32 to vector<24x24xf32>
    %108 = arith.select %77, %106, %107 : vector<24x24xi1>, vector<24x24xf32>
    %cst_66 = arith.constant dense<0xFF800000> : vector<24xf32>
    %109 = vector.multi_reduction <maximumf>, %108, %cst_66 [1] : vector<24x24xf32> to vector<24xf32>
    %110 = vector.shape_cast %109 : vector<24xf32> to vector<24x1xf32>
    %111 = vector.broadcast %110 : vector<24x1xf32> to vector<24x24xf32>
    %112 = arith.subf %108, %111 : vector<24x24xf32>
    %113 = math.exp %112 : vector<24x24xf32>
    %cst_67 = arith.constant dense<0.000000e+00> : vector<24xf32>
    %114 = vector.multi_reduction <add>, %113, %cst_67 [1] : vector<24x24xf32> to vector<24xf32>
    %115 = vector.shape_cast %114 : vector<24xf32> to vector<24x1xf32>
    %116 = tpu.reciprocal %115 {approx = true} : vector<24x1xf32> -> vector<24x1xf32>
    %117 = vector.broadcast %116 : vector<24x1xf32> to vector<24x24xf32>
    %118 = arith.mulf %113, %117 : vector<24x24xf32>
    %cst_68 = arith.constant dense<0.000000e+00> : vector<24x8xf32>
    %119 = tpu.matmul %118, %103, %cst_68 {dimension_numbers = #tpu.dot_dimension_numbers<[1], [0], [0], [1], [0, 0, 1, 1], [], []>} : vector<24x24xf32>, vector<24x8xf32>, vector<24x8xf32> -> vector<24x8xf32>
    %c8 = arith.constant 8 : index
    %c0_69 = arith.constant 0 : index
    %120 = vector.load %arg13[%c8, %c0_69] : memref<32x32xf32, #tpu.memory_space<vmem>>, vector<8x32xf32>
    %cst_70 = arith.constant dense<0.000000e+00> : vector<24x32xf32>
    %121 = tpu.matmul %119, %120, %cst_70 {dimension_numbers = #tpu.dot_dimension_numbers<[1], [0], [0], [1], [0, 0, 1, 1], [], []>} : vector<24x8xf32>, vector<8x32xf32>, vector<24x32xf32> -> vector<24x32xf32>
    %122 = arith.addf %100, %121 : vector<24x32xf32>
    %123 = vector.extract_strided_slice %74 {offsets = [0, 16], sizes = [24, 8], strides = [1, 1]} : vector<24x96xf32> to vector<24x8xf32>
    %124 = vector.extract_strided_slice %74 {offsets = [0, 48], sizes = [24, 8], strides = [1, 1]} : vector<24x96xf32> to vector<24x8xf32>
    %125 = vector.extract_strided_slice %74 {offsets = [0, 80], sizes = [24, 8], strides = [1, 1]} : vector<24x96xf32> to vector<24x8xf32>
    %cst_71 = arith.constant dense<0.000000e+00> : vector<24x24xf32>
    %126 = tpu.matmul %123, %124, %cst_71 {dimension_numbers = #tpu.dot_dimension_numbers<[1], [1], [0], [0], [0, 0, 1, 0], [], []>} : vector<24x8xf32>, vector<24x8xf32>, vector<24x24xf32> -> vector<24x24xf32>
    %cst_72 = arith.constant 0.353553385 : f32
    %127 = vector.broadcast %cst_72 : f32 to vector<24x24xf32>
    %128 = arith.mulf %126, %127 : vector<24x24xf32>
    %cst_73 = arith.constant -1.000000e+30 : f32
    %129 = vector.broadcast %cst_73 : f32 to vector<24x24xf32>
    %130 = arith.select %77, %128, %129 : vector<24x24xi1>, vector<24x24xf32>
    %cst_74 = arith.constant dense<0xFF800000> : vector<24xf32>
    %131 = vector.multi_reduction <maximumf>, %130, %cst_74 [1] : vector<24x24xf32> to vector<24xf32>
    %132 = vector.shape_cast %131 : vector<24xf32> to vector<24x1xf32>
    %133 = vector.broadcast %132 : vector<24x1xf32> to vector<24x24xf32>
    %134 = arith.subf %130, %133 : vector<24x24xf32>
    %135 = math.exp %134 : vector<24x24xf32>
    %cst_75 = arith.constant dense<0.000000e+00> : vector<24xf32>
    %136 = vector.multi_reduction <add>, %135, %cst_75 [1] : vector<24x24xf32> to vector<24xf32>
    %137 = vector.shape_cast %136 : vector<24xf32> to vector<24x1xf32>
    %138 = tpu.reciprocal %137 {approx = true} : vector<24x1xf32> -> vector<24x1xf32>
    %139 = vector.broadcast %138 : vector<24x1xf32> to vector<24x24xf32>
    %140 = arith.mulf %135, %139 : vector<24x24xf32>
    %cst_76 = arith.constant dense<0.000000e+00> : vector<24x8xf32>
    %141 = tpu.matmul %140, %125, %cst_76 {dimension_numbers = #tpu.dot_dimension_numbers<[1], [0], [0], [1], [0, 0, 1, 1], [], []>} : vector<24x24xf32>, vector<24x8xf32>, vector<24x8xf32> -> vector<24x8xf32>
    %c16_77 = arith.constant 16 : index
    %c0_78 = arith.constant 0 : index
    %142 = vector.load %arg13[%c16_77, %c0_78] : memref<32x32xf32, #tpu.memory_space<vmem>>, vector<8x32xf32>
    %cst_79 = arith.constant dense<0.000000e+00> : vector<24x32xf32>
    %143 = tpu.matmul %141, %142, %cst_79 {dimension_numbers = #tpu.dot_dimension_numbers<[1], [0], [0], [1], [0, 0, 1, 1], [], []>} : vector<24x8xf32>, vector<8x32xf32>, vector<24x32xf32> -> vector<24x32xf32>
    %144 = arith.addf %122, %143 : vector<24x32xf32>
    %145 = vector.extract_strided_slice %74 {offsets = [0, 24], sizes = [24, 8], strides = [1, 1]} : vector<24x96xf32> to vector<24x8xf32>
    %146 = vector.extract_strided_slice %74 {offsets = [0, 56], sizes = [24, 8], strides = [1, 1]} : vector<24x96xf32> to vector<24x8xf32>
    %147 = vector.extract_strided_slice %74 {offsets = [0, 88], sizes = [24, 8], strides = [1, 1]} : vector<24x96xf32> to vector<24x8xf32>
    %cst_80 = arith.constant dense<0.000000e+00> : vector<24x24xf32>
    %148 = tpu.matmul %145, %146, %cst_80 {dimension_numbers = #tpu.dot_dimension_numbers<[1], [1], [0], [0], [0, 0, 1, 0], [], []>} : vector<24x8xf32>, vector<24x8xf32>, vector<24x24xf32> -> vector<24x24xf32>
    %cst_81 = arith.constant 0.353553385 : f32
    %149 = vector.broadcast %cst_81 : f32 to vector<24x24xf32>
    %150 = arith.mulf %148, %149 : vector<24x24xf32>
    %cst_82 = arith.constant -1.000000e+30 : f32
    %151 = vector.broadcast %cst_82 : f32 to vector<24x24xf32>
    %152 = arith.select %77, %150, %151 : vector<24x24xi1>, vector<24x24xf32>
    %cst_83 = arith.constant dense<0xFF800000> : vector<24xf32>
    %153 = vector.multi_reduction <maximumf>, %152, %cst_83 [1] : vector<24x24xf32> to vector<24xf32>
    %154 = vector.shape_cast %153 : vector<24xf32> to vector<24x1xf32>
    %155 = vector.broadcast %154 : vector<24x1xf32> to vector<24x24xf32>
    %156 = arith.subf %152, %155 : vector<24x24xf32>
    %157 = math.exp %156 : vector<24x24xf32>
    %cst_84 = arith.constant dense<0.000000e+00> : vector<24xf32>
    %158 = vector.multi_reduction <add>, %157, %cst_84 [1] : vector<24x24xf32> to vector<24xf32>
    %159 = vector.shape_cast %158 : vector<24xf32> to vector<24x1xf32>
    %160 = tpu.reciprocal %159 {approx = true} : vector<24x1xf32> -> vector<24x1xf32>
    %161 = vector.broadcast %160 : vector<24x1xf32> to vector<24x24xf32>
    %162 = arith.mulf %157, %161 : vector<24x24xf32>
    %cst_85 = arith.constant dense<0.000000e+00> : vector<24x8xf32>
    %163 = tpu.matmul %162, %147, %cst_85 {dimension_numbers = #tpu.dot_dimension_numbers<[1], [0], [0], [1], [0, 0, 1, 1], [], []>} : vector<24x24xf32>, vector<24x8xf32>, vector<24x8xf32> -> vector<24x8xf32>
    %c24 = arith.constant 24 : index
    %c0_86 = arith.constant 0 : index
    %164 = vector.load %arg13[%c24, %c0_86] : memref<32x32xf32, #tpu.memory_space<vmem>>, vector<8x32xf32>
    %cst_87 = arith.constant dense<0.000000e+00> : vector<24x32xf32>
    %165 = tpu.matmul %163, %164, %cst_87 {dimension_numbers = #tpu.dot_dimension_numbers<[1], [0], [0], [1], [0, 0, 1, 1], [], []>} : vector<24x8xf32>, vector<8x32xf32>, vector<24x32xf32> -> vector<24x32xf32>
    %166 = arith.addf %144, %165 : vector<24x32xf32>
    %167 = arith.addf %44, %166 : vector<24x32xf32>
    %c0_88 = arith.constant 0 : index
    %c0_89 = arith.constant 0 : index
    %168 = vector.load %arg14[%c0_88, %c0_89] : memref<1x32xf32, #tpu.memory_space<vmem>>, vector<1x32xf32>
    %169 = vector.broadcast %168 : vector<1x32xf32> to vector<24x32xf32>
    %170 = arith.addf %167, %169 : vector<24x32xf32>
    %cst_90 = arith.constant dense<0.000000e+00> : vector<24xf32>
    %171 = vector.multi_reduction <add>, %170, %cst_90 [1] : vector<24x32xf32> to vector<24xf32>
    %172 = vector.shape_cast %171 : vector<24xf32> to vector<24x1xf32>
    %cst_91 = arith.constant 3.200000e+01 : f32
    %173 = vector.broadcast %cst_91 : f32 to vector<24x1xf32>
    %174 = arith.divf %172, %173 : vector<24x1xf32>
    %175 = vector.broadcast %174 : vector<24x1xf32> to vector<24x32xf32>
    %176 = arith.subf %170, %175 : vector<24x32xf32>
    %177 = arith.mulf %176, %176 : vector<24x32xf32>
    %cst_92 = arith.constant dense<0.000000e+00> : vector<24xf32>
    %178 = vector.multi_reduction <add>, %177, %cst_92 [1] : vector<24x32xf32> to vector<24xf32>
    %179 = vector.shape_cast %178 : vector<24xf32> to vector<24x1xf32>
    %cst_93 = arith.constant 3.200000e+01 : f32
    %180 = vector.broadcast %cst_93 : f32 to vector<24x1xf32>
    %181 = arith.divf %179, %180 : vector<24x1xf32>
    %182 = vector.broadcast %174 : vector<24x1xf32> to vector<24x32xf32>
    %183 = arith.subf %170, %182 : vector<24x32xf32>
    %cst_94 = arith.constant 9.99999997E-7 : f32
    %184 = vector.broadcast %cst_94 : f32 to vector<24x1xf32>
    %185 = arith.addf %181, %184 : vector<24x1xf32>
    %186 = math.rsqrt %185 : vector<24x1xf32>
    %187 = vector.broadcast %186 : vector<24x1xf32> to vector<24x32xf32>
    %188 = arith.mulf %183, %187 : vector<24x32xf32>
    %c0_95 = arith.constant 0 : index
    %c0_96 = arith.constant 0 : index
    %189 = vector.load %arg15[%c0_95, %c0_96] : memref<1x32xf32, #tpu.memory_space<vmem>>, vector<1x32xf32>
    %190 = vector.broadcast %189 : vector<1x32xf32> to vector<24x32xf32>
    %191 = arith.mulf %188, %190 : vector<24x32xf32>
    %c0_97 = arith.constant 0 : index
    %c0_98 = arith.constant 0 : index
    %192 = vector.load %arg16[%c0_97, %c0_98] : memref<1x32xf32, #tpu.memory_space<vmem>>, vector<1x32xf32>
    %193 = vector.broadcast %192 : vector<1x32xf32> to vector<24x32xf32>
    %194 = arith.addf %191, %193 : vector<24x32xf32>
    %c0_99 = arith.constant 0 : index
    %c0_100 = arith.constant 0 : index
    %195 = vector.load %arg17[%c0_99, %c0_100] : memref<32x64xbf16, #tpu.memory_space<vmem>>, vector<32x64xbf16>
    %196 = arith.truncf %194 : vector<24x32xf32> to vector<24x32xbf16>
    %cst_101 = arith.constant dense<0.000000e+00> : vector<24x64xf32>
    %197 = tpu.matmul %196, %195, %cst_101 {dimension_numbers = #tpu.dot_dimension_numbers<[1], [0], [0], [1], [0, 0, 1, 1], [], []>} : vector<24x32xbf16>, vector<32x64xbf16>, vector<24x64xf32> -> vector<24x64xf32>
    %c0_102 = arith.constant 0 : index
    %c0_103 = arith.constant 0 : index
    %198 = vector.load %arg18[%c0_102, %c0_103] : memref<1x64xf32, #tpu.memory_space<vmem>>, vector<1x64xf32>
    %199 = vector.broadcast %198 : vector<1x64xf32> to vector<24x64xf32>
    %200 = arith.addf %197, %199 : vector<24x64xf32>
    %201 = arith.mulf %200, %200 : vector<24x64xf32>
    %202 = arith.mulf %200, %201 : vector<24x64xf32>
    %cst_104 = arith.constant 4.471500e-02 : f32
    %203 = vector.broadcast %cst_104 : f32 to vector<24x64xf32>
    %204 = arith.mulf %203, %202 : vector<24x64xf32>
    %205 = arith.addf %200, %204 : vector<24x64xf32>
    %cst_105 = arith.constant 0.797884583 : f32
    %206 = vector.broadcast %cst_105 : f32 to vector<24x64xf32>
    %207 = arith.mulf %206, %205 : vector<24x64xf32>
    %208 = math.tanh %207 : vector<24x64xf32>
    %cst_106 = arith.constant 1.000000e+00 : f32
    %209 = vector.broadcast %cst_106 : f32 to vector<24x64xf32>
    %210 = arith.addf %209, %208 : vector<24x64xf32>
    %cst_107 = arith.constant 5.000000e-01 : f32
    %211 = vector.broadcast %cst_107 : f32 to vector<24x64xf32>
    %212 = arith.mulf %211, %210 : vector<24x64xf32>
    %213 = arith.mulf %200, %212 : vector<24x64xf32>
    %c0_108 = arith.constant 0 : index
    %c0_109 = arith.constant 0 : index
    %214 = vector.load %arg19[%c0_108, %c0_109] : memref<64x32xbf16, #tpu.memory_space<vmem>>, vector<64x32xbf16>
    %215 = arith.truncf %213 : vector<24x64xf32> to vector<24x64xbf16>
    %cst_110 = arith.constant dense<0.000000e+00> : vector<24x32xf32>
    %216 = tpu.matmul %215, %214, %cst_110 {dimension_numbers = #tpu.dot_dimension_numbers<[1], [0], [0], [1], [0, 0, 1, 1], [], []>} : vector<24x64xbf16>, vector<64x32xbf16>, vector<24x32xf32> -> vector<24x32xf32>
    %217 = arith.addf %170, %216 : vector<24x32xf32>
    %c0_111 = arith.constant 0 : index
    %c0_112 = arith.constant 0 : index
    %218 = vector.load %arg20[%c0_111, %c0_112] : memref<1x32xf32, #tpu.memory_space<vmem>>, vector<1x32xf32>
    %219 = vector.broadcast %218 : vector<1x32xf32> to vector<24x32xf32>
    %220 = arith.addf %217, %219 : vector<24x32xf32>
    %cst_113 = arith.constant dense<0.000000e+00> : vector<24xf32>
    %221 = vector.multi_reduction <add>, %220, %cst_113 [1] : vector<24x32xf32> to vector<24xf32>
    %222 = vector.shape_cast %221 : vector<24xf32> to vector<24x1xf32>
    %cst_114 = arith.constant 3.200000e+01 : f32
    %223 = vector.broadcast %cst_114 : f32 to vector<24x1xf32>
    %224 = arith.divf %222, %223 : vector<24x1xf32>
    %225 = vector.broadcast %224 : vector<24x1xf32> to vector<24x32xf32>
    %226 = arith.subf %220, %225 : vector<24x32xf32>
    %227 = arith.mulf %226, %226 : vector<24x32xf32>
    %cst_115 = arith.constant dense<0.000000e+00> : vector<24xf32>
    %228 = vector.multi_reduction <add>, %227, %cst_115 [1] : vector<24x32xf32> to vector<24xf32>
    %229 = vector.shape_cast %228 : vector<24xf32> to vector<24x1xf32>
    %cst_116 = arith.constant 3.200000e+01 : f32
    %230 = vector.broadcast %cst_116 : f32 to vector<24x1xf32>
    %231 = arith.divf %229, %230 : vector<24x1xf32>
    %232 = vector.broadcast %224 : vector<24x1xf32> to vector<24x32xf32>
    %233 = arith.subf %220, %232 : vector<24x32xf32>
    %cst_117 = arith.constant 9.99999997E-7 : f32
    %234 = vector.broadcast %cst_117 : f32 to vector<24x1xf32>
    %235 = arith.addf %231, %234 : vector<24x1xf32>
    %236 = math.rsqrt %235 : vector<24x1xf32>
    %237 = vector.broadcast %236 : vector<24x1xf32> to vector<24x32xf32>
    %238 = arith.mulf %233, %237 : vector<24x32xf32>
    %c0_118 = arith.constant 0 : index
    %c0_119 = arith.constant 0 : index
    %239 = vector.load %arg21[%c0_118, %c0_119] : memref<1x32xf32, #tpu.memory_space<vmem>>, vector<1x32xf32>
    %240 = vector.broadcast %239 : vector<1x32xf32> to vector<24x32xf32>
    %241 = arith.mulf %238, %240 : vector<24x32xf32>
    %c0_120 = arith.constant 0 : index
    %c0_121 = arith.constant 0 : index
    %242 = vector.load %arg22[%c0_120, %c0_121] : memref<1x32xf32, #tpu.memory_space<vmem>>, vector<1x32xf32>
    %243 = vector.broadcast %242 : vector<1x32xf32> to vector<24x32xf32>
    %244 = arith.addf %241, %243 : vector<24x32xf32>
    %245 = vector.extract_strided_slice %244 {offsets = [16, 0], sizes = [1, 32], strides = [1, 1]} : vector<24x32xf32> to vector<1x32xf32>
    %c0_122 = arith.constant 0 : index
    %c0_123 = arith.constant 0 : index
    %246 = vector.load %arg23[%c0_122, %c0_123] : memref<96x64xbf16, #tpu.memory_space<vmem>>, vector<64x64xbf16>
    %247 = arith.truncf %28 : vector<1x64xf32> to vector<1x64xbf16>
    %cst_124 = arith.constant dense<0.000000e+00> : vector<1x64xf32>
    %248 = tpu.matmul %247, %246, %cst_124 {dimension_numbers = #tpu.dot_dimension_numbers<[1], [0], [0], [1], [0, 0, 1, 1], [], []>} : vector<1x64xbf16>, vector<64x64xbf16>, vector<1x64xf32> -> vector<1x64xf32>
    %c64 = arith.constant 64 : index
    %c0_125 = arith.constant 0 : index
    %249 = vector.load %arg23[%c64, %c0_125] : memref<96x64xbf16, #tpu.memory_space<vmem>>, vector<32x64xbf16>
    %250 = arith.truncf %245 : vector<1x32xf32> to vector<1x32xbf16>
    %cst_126 = arith.constant dense<0.000000e+00> : vector<1x64xf32>
    %251 = tpu.matmul %250, %249, %cst_126 {dimension_numbers = #tpu.dot_dimension_numbers<[1], [0], [0], [1], [0, 0, 1, 1], [], []>} : vector<1x32xbf16>, vector<32x64xbf16>, vector<1x64xf32> -> vector<1x64xf32>
    %252 = arith.addf %248, %251 : vector<1x64xf32>
    %c0_127 = arith.constant 0 : index
    %c0_128 = arith.constant 0 : index
    %253 = vector.load %arg24[%c0_127, %c0_128] : memref<1x64xf32, #tpu.memory_space<vmem>>, vector<1x64xf32>
    %254 = arith.addf %252, %253 : vector<1x64xf32>
    %cst_129 = arith.constant 0.000000e+00 : f32
    %255 = vector.broadcast %cst_129 : f32 to vector<1x64xf32>
    %256 = arith.maximumf %254, %255 : vector<1x64xf32>
    %c0_130 = arith.constant 0 : index
    %c0_131 = arith.constant 0 : index
    %257 = vector.load %arg25[%c0_130, %c0_131] : memref<64x10xbf16, #tpu.memory_space<vmem>>, vector<64x10xbf16>
    %258 = arith.truncf %256 : vector<1x64xf32> to vector<1x64xbf16>
    %cst_132 = arith.constant dense<0.000000e+00> : vector<1x10xf32>
    %259 = tpu.matmul %258, %257, %cst_132 {dimension_numbers = #tpu.dot_dimension_numbers<[1], [0], [0], [1], [0, 0, 1, 1], [], []>} : vector<1x64xbf16>, vector<64x10xbf16>, vector<1x10xf32> -> vector<1x10xf32>
    %c0_133 = arith.constant 0 : index
    %c0_134 = arith.constant 0 : index
    %260 = vector.load %arg26[%c0_133, %c0_134] : memref<1x10xf32, #tpu.memory_space<vmem>>, vector<1x10xf32>
    %261 = arith.addf %259, %260 : vector<1x10xf32>
    %c0_135 = arith.constant 0 : index
    %c0_136 = arith.constant 0 : index
    %c0_137 = arith.constant 0 : index
    %262 = vector.load %arg27[%c0_135, %c0_136, %c0_137] : memref<1x1x10xf32, #tpu.memory_space<vmem>>, vector<1x1x10xf32>
    %263 = vector.shape_cast %262 : vector<1x1x10xf32> to vector<1x10xf32>
    %264 = vector.shape_cast %261 : vector<1x10xf32> to vector<1x1x10xf32>
    tpu.vector_store %arg27[%c0_135, %c0_136, %c0_137], %264 {strides = array<i32>} : memref<1x1x10xf32, #tpu.memory_space<vmem>>, vector<1x1x10xf32>,
    return
  }
  func.func @transform_0(%arg0: i32) -> (i32, i32, i32) {
    %c0_i32 = arith.constant 0 : i32
    %c0_i32_0 = arith.constant 0 : i32
    %c0_i32_1 = arith.constant 0 : i32
    return %arg0, %c0_i32, %c0_i32_0 : i32, i32, i32
  }
  func.func @transform_1(%arg0: i32) -> (i32, i32) {
    %c0_i32 = arith.constant 0 : i32
    %c0_i32_0 = arith.constant 0 : i32
    %c0_i32_1 = arith.constant 0 : i32
    return %c0_i32, %c0_i32_0 : i32, i32
  }
  func.func @transform_2(%arg0: i32) -> (i32, i32) {
    %c0_i32 = arith.constant 0 : i32
    %c0_i32_0 = arith.constant 0 : i32
    %c0_i32_1 = arith.constant 0 : i32
    return %c0_i32, %c0_i32_0 : i32, i32
  }
  func.func @transform_3(%arg0: i32) -> (i32, i32, i32) {
    %c0_i32 = arith.constant 0 : i32
    %c0_i32_0 = arith.constant 0 : i32
    %c0_i32_1 = arith.constant 0 : i32
    return %arg0, %c0_i32, %c0_i32_0 : i32, i32, i32
  }
  func.func @transform_4(%arg0: i32) -> (i32, i32) {
    %c0_i32 = arith.constant 0 : i32
    %c0_i32_0 = arith.constant 0 : i32
    %c0_i32_1 = arith.constant 0 : i32
    return %c0_i32, %c0_i32_0 : i32, i32
  }
  func.func @transform_5(%arg0: i32) -> (i32, i32) {
    %c0_i32 = arith.constant 0 : i32
    %c0_i32_0 = arith.constant 0 : i32
    %c0_i32_1 = arith.constant 0 : i32
    return %c0_i32, %c0_i32_0 : i32, i32
  }
  func.func @transform_6(%arg0: i32) -> (i32, i32) {
    %c0_i32 = arith.constant 0 : i32
    %c0_i32_0 = arith.constant 0 : i32
    %c0_i32_1 = arith.constant 0 : i32
    return %c0_i32, %c0_i32_0 : i32, i32
  }
  func.func @transform_7(%arg0: i32) -> (i32, i32) {
    %c0_i32 = arith.constant 0 : i32
    %c0_i32_0 = arith.constant 0 : i32
    %c0_i32_1 = arith.constant 0 : i32
    return %c0_i32, %c0_i32_0 : i32, i32
  }
  func.func @transform_8(%arg0: i32) -> (i32, i32) {
    %c0_i32 = arith.constant 0 : i32
    %c0_i32_0 = arith.constant 0 : i32
    %c0_i32_1 = arith.constant 0 : i32
    return %c0_i32, %c0_i32_0 : i32, i32
  }
  func.func @transform_9(%arg0: i32) -> (i32, i32) {
    %c0_i32 = arith.constant 0 : i32
    %c0_i32_0 = arith.constant 0 : i32
    %c0_i32_1 = arith.constant 0 : i32
    return %c0_i32, %c0_i32_0 : i32, i32
  }
  func.func @transform_10(%arg0: i32) -> (i32, i32) {
    %c0_i32 = arith.constant 0 : i32
    %c0_i32_0 = arith.constant 0 : i32
    %c0_i32_1 = arith.constant 0 : i32
    return %c0_i32, %c0_i32_0 : i32, i32
  }
  func.func @transform_11(%arg0: i32) -> (i32, i32) {
    %c0_i32 = arith.constant 0 : i32
    %c0_i32_0 = arith.constant 0 : i32
    %c0_i32_1 = arith.constant 0 : i32
    return %c0_i32, %c0_i32_0 : i32, i32
  }
  func.func @transform_12(%arg0: i32) -> (i32, i32) {
    %c0_i32 = arith.constant 0 : i32
    %c0_i32_0 = arith.constant 0 : i32
    %c0_i32_1 = arith.constant 0 : i32
    return %c0_i32, %c0_i32_0 : i32, i32
  }
  func.func @transform_13(%arg0: i32) -> (i32, i32) {
    %c0_i32 = arith.constant 0 : i32
    %c0_i32_0 = arith.constant 0 : i32
    %c0_i32_1 = arith.constant 0 : i32
    return %c0_i32, %c0_i32_0 : i32, i32
  }
  func.func @transform_14(%arg0: i32) -> (i32, i32) {
    %c0_i32 = arith.constant 0 : i32
    %c0_i32_0 = arith.constant 0 : i32
    %c0_i32_1 = arith.constant 0 : i32
    return %c0_i32, %c0_i32_0 : i32, i32
  }
  func.func @transform_15(%arg0: i32) -> (i32, i32) {
    %c0_i32 = arith.constant 0 : i32
    %c0_i32_0 = arith.constant 0 : i32
    %c0_i32_1 = arith.constant 0 : i32
    return %c0_i32, %c0_i32_0 : i32, i32
  }
  func.func @transform_16(%arg0: i32) -> (i32, i32) {
    %c0_i32 = arith.constant 0 : i32
    %c0_i32_0 = arith.constant 0 : i32
    %c0_i32_1 = arith.constant 0 : i32
    return %c0_i32, %c0_i32_0 : i32, i32
  }
  func.func @transform_17(%arg0: i32) -> (i32, i32) {
    %c0_i32 = arith.constant 0 : i32
    %c0_i32_0 = arith.constant 0 : i32
    %c0_i32_1 = arith.constant 0 : i32
    return %c0_i32, %c0_i32_0 : i32, i32
  }
  func.func @transform_18(%arg0: i32) -> (i32, i32) {
    %c0_i32 = arith.constant 0 : i32
    %c0_i32_0 = arith.constant 0 : i32
    %c0_i32_1 = arith.constant 0 : i32
    return %c0_i32, %c0_i32_0 : i32, i32
  }
  func.func @transform_19(%arg0: i32) -> (i32, i32) {
    %c0_i32 = arith.constant 0 : i32
    %c0_i32_0 = arith.constant 0 : i32
    %c0_i32_1 = arith.constant 0 : i32
    return %c0_i32, %c0_i32_0 : i32, i32
  }
  func.func @transform_20(%arg0: i32) -> (i32, i32) {
    %c0_i32 = arith.constant 0 : i32
    %c0_i32_0 = arith.constant 0 : i32
    %c0_i32_1 = arith.constant 0 : i32
    return %c0_i32, %c0_i32_0 : i32, i32
  }
  func.func @transform_21(%arg0: i32) -> (i32, i32) {
    %c0_i32 = arith.constant 0 : i32
    %c0_i32_0 = arith.constant 0 : i32
    %c0_i32_1 = arith.constant 0 : i32
    return %c0_i32, %c0_i32_0 : i32, i32
  }
  func.func @transform_22(%arg0: i32) -> (i32, i32) {
    %c0_i32 = arith.constant 0 : i32
    %c0_i32_0 = arith.constant 0 : i32
    %c0_i32_1 = arith.constant 0 : i32
    return %c0_i32, %c0_i32_0 : i32, i32
  }
  func.func @transform_23(%arg0: i32) -> (i32, i32) {
    %c0_i32 = arith.constant 0 : i32
    %c0_i32_0 = arith.constant 0 : i32
    %c0_i32_1 = arith.constant 0 : i32
    return %c0_i32, %c0_i32_0 : i32, i32
  }
  func.func @transform_24(%arg0: i32) -> (i32, i32) {
    %c0_i32 = arith.constant 0 : i32
    %c0_i32_0 = arith.constant 0 : i32
    %c0_i32_1 = arith.constant 0 : i32
    return %c0_i32, %c0_i32_0 : i32, i32
  }
  func.func @transform_25(%arg0: i32) -> (i32, i32) {
    %c0_i32 = arith.constant 0 : i32
    %c0_i32_0 = arith.constant 0 : i32
    %c0_i32_1 = arith.constant 0 : i32
    return %c0_i32, %c0_i32_0 : i32, i32
  }
  func.func @transform_26(%arg0: i32) -> (i32, i32, i32) {
    %c0_i32 = arith.constant 0 : i32
    %c0_i32_0 = arith.constant 0 : i32
    %c0_i32_1 = arith.constant 0 : i32
    return %arg0, %c0_i32, %c0_i32_0 : i32, i32, i32
  }
}

</mosaic_0001>

<bundles_post_ra>
// kernel: parallel_cnn_vit_forward.1
= control target key start
LH: loop header
LB: loop body
LE: loop exit
PB: predicated region body
PF: predicated region fallthrough
CT: control target
= control target key end

     0   :  { %s5050_s0 = inlined_call_operand.vmem [shape: f32[2,256,36], index: 0, kind: input, shape index: {}]   ;;  %s5051_s1 = inlined_call_operand.vmem [shape: bf16[36,64], index: 1, kind: input, shape index: {}]   ;;  %s5052_s2 = inlined_call_operand.vmem [shape: f32[1,64], index: 2, kind: input, shape index: {}]   ;;  %s5053_s3 = inlined_call_operand.vmem [shape: f32[2,16,64], index: 3, kind: input, shape index: {}]   ;;  %s5054_s4 = inlined_call_operand.vmem [shape: bf16[64,32], index: 4, kind: input, shape index: {}]   ;;  %s5055_s5 = inlined_call_operand.vmem [shape: f32[1,32], index: 5, kind: input, shape index: {}]   ;;  %s5056_s6 = inlined_call_operand.vmem [shape: f32[1,32], index: 6, kind: input, shape index: {}]   ;;  %s5057_s7 = inlined_call_operand.vmem [shape: f32[16,32], index: 7, kind: input, shape index: {}]   ;;  %s5058_s8 = inlined_call_operand.vmem [shape: f32[1,32], index: 8, kind: input, shape index: {}]   ;;  %s5059_s9 = inlined_call_operand.vmem [shape: f32[1,32], index: 9, kind: input, shape index: {}]   ;;  %s5060_s10 = inlined_call_operand.vmem [shape: bf16[32,96], index: 10, kind: input, shape index: {}]   ;;  %s5061_s11 = inlined_call_operand.vmem [shape: f32[1,96], index: 11, kind: input, shape index: {}]   ;;  %s5062_s12 = inlined_call_operand.vmem [shape: f32[32,32], index: 12, kind: input, shape index: {}]   ;;  %s5063_s13 = inlined_call_operand.vmem [shape: f32[1,32], index: 13, kind: input, shape index: {}]   ;;  %s5064_s14 = inlined_call_operand.vmem [shape: f32[1,32], index: 14, kind: input, shape index: {}]   ;;  %s5065_s15 = inlined_call_operand.vmem [shape: f32[1,32], index: 15, kind: input, shape index: {}]   ;;  %s5066_s16 = inlined_call_operand.vmem [shape: bf16[32,64], index: 16, kind: input, shape index: {}]   ;;  %s5067_s17 = inlined_call_operand.vmem [shape: f32[1,64], index: 17, kind: input, shape index: {}]   ;;  %s5068_s18 = inlined_call_operand.vmem [shape: bf16[64,32], index: 18, kind: input, shape index: {}]   ;;  %s5069_s19 = inlined_call_operand.vmem [shape: f32[1,32], index: 19, kind: input, shape index: {}]   ;;  %s5070_s20 = inlined_call_operand.vmem [shape: f32[1,32], index: 20, kind: input, shape index: {}]   ;;  %s5071_s21 = inlined_call_operand.vmem [shape: f32[1,32], index: 21, kind: input, shape index: {}]   ;;  %s5072_s22 = inlined_call_operand.vmem [shape: bf16[96,64], index: 22, kind: input, shape index: {}]   ;;  %s5073_s23 = inlined_call_operand.vmem [shape: f32[1,64], index: 23, kind: input, shape index: {}]   ;;  %s5074_s24 = inlined_call_operand.vmem [shape: bf16[64,10], index: 24, kind: input, shape index: {}]   ;;  %s5075_s25 = inlined_call_operand.vmem [shape: f32[1,10], index: 25, kind: input, shape index: {}]   ;;  %s5076_s26 = inlined_call_operand.hbm [shape: f32[2,1,10], index: 26, kind: output, shape index: {}]  }
   0x1   :  { %5087 = sst [smem:[#allocation9_spill]] %s5050_s0 }
   0x2   :  { %5088 = sst [smem:[#allocation10_spill]] %s5051_s1 }
   0x3   :  { %5089 = sst [smem:[#allocation11_spill]] %s5052_s2 }
   0x4   :  { %5090 = sst [smem:[#allocation12_spill]] %s5053_s3 }
   0x5   :  { %5091 = sst [smem:[#allocation13_spill]] %s5054_s4 }
   0x6   :  { %5092 = sst [smem:[#allocation14_spill]] %s5055_s5 }
   0x7   :  { %5093 = sst [smem:[#allocation15_spill]] %s5056_s6 }
   0x8   :  { %5094 = sst [smem:[#allocation16_spill]] %s5057_s7 }
   0x9   :  { %5095 = sst [smem:[#allocation17_spill]] %s5058_s8 }
   0xa   :  { %5096 = sst [smem:[#allocation18_spill]] %s5059_s9 }
   0xb   :  { %5097 = sst [smem:[#allocation19_spill]] %s5060_s10 }
   0xc   :  { %5098 = sst [smem:[#allocation20_spill]] %s5061_s11 }
   0xd   :  { %5099 = sst [smem:[#allocation21_spill]] %s5062_s12 }
   0xe   :  { %31 = vsyncpa [#allocation4], 0 }
   0xf   :  { %33 = vsyncpa [#allocation4 + $0x1], 0  ;;  %s4370_s27 = smov 0   ;;  %s4372_s3 = smov 0  }
  0x10   :  { %s4374_s7 = smov 0   ;;  %s4376_s28 = smov 0  }
  0x11 LB: > { %5100 = sst [smem:[#allocation6_spill]] %s4214_s7  ;;  %s4391_s8 = sadd.s32 4294967295, %s4218_s28   ;;  %s4218_s28 = sphi %s4376_s28, %s5120_s28   ;;  %s4214_s7 = sphi %s4374_s7, %s5122_s7   ;;  %s4210_s3 = sphi %s4372_s3, %s5124_s3   ;;  %s4206_s27 = sphi %s4370_s27, %s5123_s27  }
  0x12   : > { %s3415_s4 = sadd.s32 4294967294, %s4218_s28   ;;  %s4395_s29 = sadd.s32 1, %s4218_s28  }
  0x13   : > { %5101 = sst [smem:[#allocation7_spill]] %s4395_s29  ;;  %s602_s0 = sadd.s32 1, %s4214_s7 }
  0x14   : > { %s599_s9 = ssub.s32 %s4218_s28, %s4395_s29  ;;  %p612_p0 = scmp.ne.s32.totalorder %s4214_s7, %s4210_s3 }
  0x15   : > { %p600_p1 = scmp.eq.s32.totalorder %s599_s9, 0  ;;  %p613_p2 = scmp.eq.s32.totalorder %s4391_s8, 1 }
  0x16   : > { %p618_p3 = scmp.ne.s32.totalorder %s4210_s3, %s4206_s27  ;;  %p619_p4 = scmp.eq.s32.totalorder %s3415_s4, 1 }
  0x17   : > { %s4406_s30 = scalar_select %p600_p1, %s4214_s7, %s602_s0  }
  0x18   : > { %p4408_p5 = por %p613_p2, %p612_p0  ;;  %p4412_p6 = por %p619_p4, %p618_p3 }
  0x19   : > { %5102 = sst [smem:[#allocation8_spill]] %s4406_s30  ;;  %p3418_p7 = scmp.ge.s32.totalorder %s4218_s28, 1 }
  0x1a   : > { %p725_p8 = scmp.lt.s32.totalorder %s4218_s28, 3 }
  0x1c   : > { %p726_p9 = pnand %p3418_p7, %p725_p8 }
  0x1d   : > { %s5105_s1 = sld [smem:[#allocation10_spill]] (!%p726_p9)  ;;  %p799_p10 = scmp.lt.s32.totalorder (!%p726_p9), %s4391_s8, 1  ;;  %vm886_vm0 = vcmask (!%p726_p9), 1041408   ;;  %vm861_vm1 = vcmask (!%p726_p9), 293888   ;;  %v4220_v22 = vmov (!%p726_p9), 0.0   ;;  %vm4221_vm2 = vmmov (!%p726_p9), 0  }
  0x1e   : > { %729 = sbr.rel (%p726_p9) target bundleno = 5387 (0x150b), region = 124  ;;  %s5106_s4 = sld [smem:[#allocation9_spill]] (!%p726_p9)  ;;  %vm1003_vm3 = vcmask (!%p726_p9), 523264   ;;  %vm1328_vm4 = vcmask (!%p726_p9), 261120   ;;  %vm1339_vm5 = vcmask (!%p726_p9), 253952   ;;  %vm1495_vm6 = vcmask (!%p726_p9), 64512  }
  0x1f   : > { %s5107_s9 = sld [smem:[#allocation13_spill]] (!%p726_p9)  ;;  %s5108_s30 = sld [smem:[#allocation12_spill]] (!%p726_p9)  ;;  %1329 = vst.msk [vmem:[#allocation2] sm:$0xff] (!%p726_p9), %vm1328_vm4, %v4220_v22  ;;  %1330 = vst.msk [vmem:[#allocation2 + $0x8] sm:$0xff] (!%p726_p9), %vm1328_vm4, %v4220_v22  ;;  %vm1594_vm9 = vcmask (!%p726_p9), 195584   ;;  %vm3333_vm10 = vcmask (!%p726_p9), 73728  }
  0x20   : > { %1331 = vst.msk [vmem:[#allocation2 + $0x10] sm:$0xff] (!%p726_p9), %vm1328_vm4, %v4220_v22  ;;  %s5112_s29 = sld [smem:[#allocation16_spill]] (!%p726_p9)  ;;  %s5116_s11 = sld [smem:[#allocation20_spill]] (!%p726_p9)  ;;  %vm4646_vm7 = vmpackc.low (!%p726_p9), %vm1495_vm6, %vm1495_vm6 }
  0x21   : > { %s5119_s12 = sld [smem:[#allocation21_spill]] (!%p726_p9) }
  0x23   : > { %v4060_v0 = vld [vmem:[%s5105_s1] sm:$0xff] (!%p726_p9)   ;;  %v4061_v1 = vld [vmem:[%s5105_s1 + $0x8] sm:$0xff] (!%p726_p9)   ;;  %v4062_v2 = vld [vmem:[%s5105_s1 + $0x10] ss:$0 sps:$4 sm:$0x33] (!%p726_p9)   ;;  %s5115_s1 = sld [smem:[#allocation18_spill]] (!%p726_p9) }
  0x24   : > { %3657 = vmatprep.subr.bf16.mxu0 (!%p726_p9), %v4060_v0  ;;  %3679 = vmatprep.subr.bf16.mxu1 (!%p726_p9), %v4060_v0  ;;  %v888_v6 = vsel (!%p726_p9), %vm886_vm0, %v4062_v2, 0 }
  0x25   : > { %3658 = vmatpush3.bf16.msra.mxu0 %v4060_v0  ;;  %3680 = vmatpush3.bf16.msra.mxu1 %v4060_v0  ;;  %s4429_s7 = scalar_select %p799_p10, %s4391_s8, 1  ;;  %v4063_v23 = vld [vmem:[%s5107_s9] sm:$0xff]   ;;  %v4064_v26 = vld [vmem:[%s5107_s9 + $0x8] sm:$0xff]   ;;  %v4065_v35 = vld [vmem:[%s5107_s9 + $0x10] sm:$0xff]  }
  0x26   : > { %3659 = vmatprep.subr.bf16.mxu0 %v4061_v1  ;;  %3681 = vmatprep.subr.bf16.mxu1 %v4061_v1  ;;  %v4066_v46 = vld [vmem:[%s5107_s9 + $0x18] sm:$0xff]  }
  0x27   : > { %s3537_s10 = sshll.u32 %s4429_s7, 8  ;;  %s3538_s6 = sshll.u32 %s4429_s7, 4 }
  0x28   : > { %s4435_s0 = scalar_lea.vmem %s5106_s4, %s3537_s10  ;;  %s808_s10 = scalar_lea.vmem %s5108_s30, %s3538_s6 }
  0x29   : > { %3660 = vmatpush3.bf16.msra.mxu0 %v4061_v1  ;;  %3682 = vmatpush3.bf16.msra.mxu1 %v4061_v1  ;;  %v810_v3 = vld [vmem:[%s4435_s0] sm:$0xff]  ;;  %v811_v4 = vld [vmem:[%s4435_s0 + $0x8] sm:$0xff]  ;;  %v812_v9 = vld [vmem:[%s4435_s0 + $0x10] sm:$0xff]  ;;  %s5109_s6 = sld [smem:[#allocation15_spill]]  ;;  %s5110_s30 = sld [smem:[#allocation11_spill]] }
  0x2a   : > { %v1042_v5 = vld [vmem:[%s4435_s0 + $0x80] sm:$0xff]  ;;  %3965 = vmatprep.subr.msk.bf16.mxu0 %vm886_vm0, %v4062_v2  ;;  %3966 = vmatprep.subr.msk.bf16.mxu1 %vm886_vm0, %v4062_v2  ;;  %v831_v7 = vpack.c.bf16 %v811_v4, %v810_v3  ;;  %v1043_v8 = vld [vmem:[%s4435_s0 + $0x88] sm:$0xff]  ;;  %v813_v10 = vld [vmem:[%s4435_s0 + $0x18] sm:$0xff]  ;;  %s4225_s4 = smov 88   ;;  %s4228_s7 = smov 80  }
  0x2b   : > { %v1058_v11 = vpack.c.bf16 %v1043_v8, %v1042_v5  ;;  %v1044_v12 = vld [vmem:[%s4435_s0 + $0x90] sm:$0xff]  ;;  %v1045_v13 = vld [vmem:[%s4435_s0 + $0x98] sm:$0xff]  ;;  %v814_v14 = vld [vmem:[%s4435_s0 + $0x20] sm:$0xff]  ;;  %v832_v15 = vpack.c.bf16 %v813_v10, %v812_v9 }
  0x2c   : > { %3663 = vmatprep.mubr.msk.bf16.mxu0 %vm861_vm1, %v831_v7  ;;  %v1059_v16 = vpack.c.bf16 %v1045_v13, %v1044_v12  ;;  %v815_v17 = vld [vmem:[%s4435_s0 + $0x28] sm:$0xff]  ;;  %v1046_v18 = vld [vmem:[%s4435_s0 + $0xa0] sm:$0xff]  ;;  %v816_v24 = vld [vmem:[%s4435_s0 + $0x30] sm:$0xff] }
  0x2d   : > { %v1047_v19 = vld [vmem:[%s4435_s0 + $0xa8] sm:$0xff]  ;;  %3662 = vmatpush3.bf16.msra.mxu0 %v888_v6  ;;  %3684 = vmatpush3.bf16.msra.mxu1 %v888_v6  ;;  %v833_v20 = vpack.c.bf16 %v815_v17, %v814_v14  ;;  %v817_v25 = vld [vmem:[%s4435_s0 + $0x38] sm:$0xff]  ;;  %v1048_v27 = vld [vmem:[%s4435_s0 + $0xb0] sm:$0xff] }
  0x2e   : > { %v1060_v21 = vpack.c.bf16 %v1047_v19, %v1046_v18  ;;  %3685 = vmatprep.mubr.msk.bf16.mxu1 %vm861_vm1, %v1058_v11  ;;  %3701 = vmatprep.subr.bf16.mxu0 %v4220_v22  ;;  %v1049_v28 = vld [vmem:[%s4435_s0 + $0xb8] sm:$0xff]  ;;  %v818_v29 = vld [vmem:[%s4435_s0 + $0x40] sm:$0xff]  ;;  %v819_v30 = vld [vmem:[%s4435_s0 + $0x48] sm:$0xff]  ;;  %v834_v33 = vpack.c.bf16 %v817_v25, %v816_v24 }
  0x2f   : > { %v1050_v31 = vld [vmem:[%s4435_s0 + $0xc0] sm:$0xff]  ;;  %v1051_v32 = vld [vmem:[%s4435_s0 + $0xc8] sm:$0xff]  ;;  %v1061_v34 = vpack.c.bf16 %v1049_v28, %v1048_v27  ;;  %v835_v36 = vpack.c.bf16 %v819_v30, %v818_v29  ;;  %v820_v38 = vld [vmem:[%s4435_s0 + $0x50] sm:$0xff] }
  0x30   : > { %3664 = vmatmul.mubr.msk.bf16.vlgmr.msra.gmra.mrb[0].mxu0 %vm861_vm1, %v832_v15  ;;  %3686 = vmatmul.mubr.msk.bf16.vlgmr.msra.gmra.mrb[0].mxu1 %vm861_vm1, %v1059_v16  ;;  %v1062_v37 = vpack.c.bf16 %v1051_v32, %v1050_v31  ;;  %v821_v39 = vld [vmem:[%s4435_s0 + $0x58] sm:$0xff]  ;;  %v1052_v40 = vld [vmem:[%s4435_s0 + $0xd0] sm:$0xff]  ;;  %v822_v42 = vld [vmem:[%s4435_s0 + $0x60] sm:$0xff] }
  0x31   : > { %3667 = vmatprep.mubr.msk.bf16.mxu0 %vm861_vm1, %v833_v20  ;;  %3689 = vmatprep.mubr.msk.bf16.mxu1 %vm861_vm1, %v1060_v21  ;;  %v1053_v41 = vld [vmem:[%s4435_s0 + $0xd8] sm:$0xff]  ;;  %v823_v43 = vld [vmem:[%s4435_s0 + $0x68] sm:$0xff]  ;;  %v1054_v44 = vld [vmem:[%s4435_s0 + $0xe0] sm:$0xff]  ;;  %v836_v47 = vpack.c.bf16 %v821_v39, %v820_v38 }
  0x32   : > { %3702 = vmatpush3.bf16.msra.mxu0 %v4063_v23  ;;  %v1055_v45 = vld [vmem:[%s4435_s0 + $0xe8] sm:$0xff]  ;;  %v1063_v48 = vpack.c.bf16 %v1053_v41, %v1052_v40  ;;  %v837_v49 = vpack.c.bf16 %v823_v43, %v822_v42  ;;  %v824_v51 = vld [vmem:[%s4435_s0 + $0x70] sm:$0xff]  ;;  %v825_v52 = vld [vmem:[%s4435_s0 + $0x78] sm:$0xff] }
  0x33   : > { %3703 = vmatprep.subr.bf16.mxu0 %v4220_v22  ;;  %v1064_v50 = vpack.c.bf16 %v1055_v45, %v1054_v44  ;;  %v1056_v53 = vld [vmem:[%s4435_s0 + $0xf0] sm:$0xff]  ;;  %v1057_v54 = vld [vmem:[%s4435_s0 + $0xf8] sm:$0xff]  ;;  %v838_v55 = vpack.c.bf16 %v825_v52, %v824_v51  ;;  %v1242_v57 = vld [vmem:[%s808_s10] sm:$0xff]  ;;  %s5111_s0 = sld [smem:[#allocation14_spill]] }
  0x34   : > { %v1065_v56 = vpack.c.bf16 %v1057_v54, %v1056_v53  ;;  %v1243_v58 = vld [vmem:[%s808_s10 + $0x8] sm:$0xff]  ;;  %v1338_v60 = vld [vmem:[%s5109_s6] sm:$0x1]  ;;  %s5113_s6 = sld [smem:[#allocation19_spill]]  ;;  %s4227_s10 = smov 56  }
  0x35   : > { %v1252_v59 = vpack.c.bf16 %v1243_v58, %v1242_v57  ;;  %1340 = vst.msk [vmem:[#allocation2 + $0x10] sm:$0x1] %vm1339_vm5, %v1338_v60  ;;  %v4526_v63 = vld [vmem:[%s5110_s30] ss:$0 sm:$0xff]  ;;  %s4226_s30 = smov 120  }
  0x36   : > { %3704 = vmatpush3.bf16.msra.mxu0 %v4064_v26 }
  0x37   : > { %3705 = vmatprep.subr.bf16.mxu0 %v4220_v22 }
  0x38   : > { %3668 = vmatmul.mubr.msk.bf16.gmra.mrb[4].mxu0 %vm861_vm1, %v834_v33  ;;  %3690 = vmatmul.mubr.msk.bf16.gmra.mrb[4].mxu1 %vm861_vm1, %v1061_v34 }
  0x39   : > { %3671 = vmatprep.mubr.msk.bf16.mxu0 %vm861_vm1, %v835_v36  ;;  %3693 = vmatprep.mubr.msk.bf16.mxu1 %vm861_vm1, %v1062_v37 }
  0x3a   : > { %3706 = vmatpush3.bf16.msra.mxu0 %v4065_v35 }
  0x3b   : > { %3707 = vmatprep.subr.bf16.mxu0 %v4220_v22 }
  0x3c   : > { %v4519_v61 = vld [vmem:[#allocation2 + $0x10] sm:$0xff] }
  0x3d   : > { %v1350_v62 = vsel %vm1328_vm4, %v4519_v61, 0.0 }
  0x3e   : > { %3708 = vmatpush3.bf16.msra.mxu0 %v4066_v46  ;;  %1351 = vadd.xlane.f32.xlu1 %v1350_v62 }
  0x40   : > { %3672 = vmatmul.mubr.msk.bf16.gmra.mrb[8].mxu0 %vm861_vm1, %v836_v47  ;;  %3694 = vmatmul.mubr.msk.bf16.gmra.mrb[8].mxu1 %vm861_vm1, %v1063_v48 }
  0x41   : > { %3675 = vmatprep.mubr.msk.bf16.mxu0 %vm861_vm1, %v837_v49  ;;  %3697 = vmatprep.mubr.msk.bf16.mxu1 %vm861_vm1, %v1064_v50 }
  0x48   : > { %3676 = vmatmul.mubr.msk.bf16.gmra.mrb[12].mxu0 %vm861_vm1, %v838_v55  ;;  %3698 = vmatmul.mubr.msk.bf16.gmra.mrb[12].mxu1 %vm861_vm1, %v1065_v56 }
  0x49   : > { %3709 = vmatprep.mubr.msk.bf16.mxu0 %vm4221_vm2, %v4220_v22 }
  0x50   : > { %3710 = vmatmul.mubr.msk.bf16.vlgmr.msra.gmra.mrb[16].mxu0 %vm1003_vm3, %v1252_v59 }
  0x51   : > { %3727 = vmatprep.mubr.msk.f32.mxu0 %vm4221_vm2, %v4220_v22 }
 0x103   : > { %v3665_v0 = vpop.f32.mrb[0].mxu0  ;;  %v3687_v1 = vpop.f32.mrb[0].mxu1 }
 0x104   : > { %v933_v2 = vadd.f32 %v3665_v0, %v4526_v63  ;;  %v1133_v3 = vadd.f32 %v3687_v1, %v4526_v63  ;;  %v924_v4 = vpop.f32.mrb[1].mxu0  ;;  %v1124_v5 = vpop.f32.mrb[1].mxu1 }
 0x105   : > { %v925_v6 = vadd.f32 %v4526_v63, %v924_v4  ;;  %v1125_v7 = vadd.f32 %v4526_v63, %v1124_v5  ;;  %v3666_v8 = vpop.f32.mrb[2].mxu0  ;;  %v3688_v9 = vpop.f32.mrb[2].mxu1 }
 0x106   : > { %v1189_v10 = vmax.f32 %v1133_v3, 0.0  ;;  %v936_v11 = vadd.f32 %v3666_v8, %v4526_v63  ;;  %v1136_v12 = vadd.f32 %v3688_v9, %v4526_v63  ;;  %v927_v13 = vpop.f32.mrb[3].mxu0  ;;  %v1127_v14 = vpop.f32.mrb[3].mxu1  ;;  %v989_v19 = vmax.f32 %v933_v2, 0.0 }
 0x107   : > { %v987_v15 = vmax.f32 %v925_v6, 0.0  ;;  %v1187_v16 = vmax.f32 %v1125_v7, 0.0  ;;  %v928_v17 = vadd.f32 %v4526_v63, %v927_v13  ;;  %v1128_v18 = vadd.f32 %v4526_v63, %v1127_v14 }
 0x108   : > { %v1190_v21 = vmax.f32 %v1136_v12, 0.0  ;;  %v1206_v25 = vsel %vm1003_vm3, %v1189_v10, 0.0  ;;  %v990_v27 = vmax.f32 %v936_v11, 0.0  ;;  %v1007_v32 = vsel %vm1003_vm3, %v989_v19, 0.0 }
 0x109   : > { %v1203_v20 = vsel %vm1003_vm3, %v1187_v16, 0.0  ;;  %v988_v23 = vmax.f32 %v928_v17, 0.0  ;;  %v1188_v24 = vmax.f32 %v1128_v18, 0.0  ;;  %v1004_v26 = vsel %vm1003_vm3, %v987_v15, 0.0 }
 0x10a   : > { %v1208_v37 = vsel %vm1003_vm3, %v1190_v21, 0.0  ;;  %v1009_v47 = vsel %vm1003_vm3, %v990_v27, 0.0 }
 0x10b   : > { %v1005_v28 = vsel %vm1003_vm3, %v988_v23, 0.0  ;;  %v1204_v29 = vsel %vm1003_vm3, %v1188_v24, 0.0  ;;  %v3669_v30 = vpop.f32.mrb[4].mxu0  ;;  %v3691_v31 = vpop.f32.mrb[4].mxu1 }
 0x10c   : > { %v1006_v33 = vadd.f32 %v1005_v28, %v1004_v26  ;;  %v1205_v34 = vadd.f32 %v1204_v29, %v1203_v20  ;;  %v940_v35 = vpop.f32.mrb[5].mxu0  ;;  %v1140_v36 = vpop.f32.mrb[5].mxu1  ;;  %v1149_v38 = vadd.f32 %v3691_v31, %v4526_v63  ;;  %v949_v48 = vadd.f32 %v3669_v30, %v4526_v63 }
 0x10d   : > { %v941_v39 = vadd.f32 %v4526_v63, %v940_v35  ;;  %v1141_v40 = vadd.f32 %v4526_v63, %v1140_v36  ;;  %v3670_v41 = vpop.f32.mrb[6].mxu0  ;;  %v3692_v42 = vpop.f32.mrb[6].mxu1 }
 0x10e   : > { %v1008_v43 = vadd.f32 %v1007_v32, %v1006_v33  ;;  %v1207_v44 = vadd.f32 %v1206_v25, %v1205_v34  ;;  %v943_v45 = vpop.f32.mrb[7].mxu0  ;;  %v1143_v46 = vpop.f32.mrb[7].mxu1  ;;  %v1152_v53 = vadd.f32 %v3692_v42, %v4526_v63  ;;  %v1193_v54 = vmax.f32 %v1149_v38, 0.0 }
 0x10f   : > { %v991_v49 = vmax.f32 %v941_v39, 0.0  ;;  %v1191_v50 = vmax.f32 %v1141_v40, 0.0  ;;  %v952_v57 = vadd.f32 %v3670_v41, %v4526_v63  ;;  %v944_v60 = vadd.f32 %v4526_v63, %v943_v45 }
 0x110   : > { %v1010_v51 = vadd.f32 %v1009_v47, %v1008_v43  ;;  %v1209_v52 = vadd.f32 %v1208_v37, %v1207_v44  ;;  %v1144_v62 = vadd.f32 %v4526_v63, %v1143_v46  ;;  %v993_v0 = vmax.f32 %v949_v48, 0.0 }
 0x111   : > { %v1011_v55 = vsel %vm1003_vm3, %v991_v49, 0.0  ;;  %v1210_v56 = vsel %vm1003_vm3, %v1191_v50, 0.0  ;;  %v1194_v3 = vmax.f32 %v1152_v53, 0.0  ;;  %v992_v4 = vmax.f32 %v944_v60, 0.0 }
 0x112   : > { %v1012_v58 = vadd.f32 %v1011_v55, %v1010_v51  ;;  %v1211_v59 = vadd.f32 %v1210_v56, %v1209_v52  ;;  %v1192_v5 = vmax.f32 %v1144_v62, 0.0  ;;  %v994_v9 = vmax.f32 %v952_v57, 0.0 }
 0x113   : > { %v3673_v1 = vpop.f32.mrb[8].mxu0  ;;  %v3695_v2 = vpop.f32.mrb[8].mxu1  ;;  %v1214_v14 = vsel %vm1003_vm3, %v1193_v54, 0.0  ;;  %v1013_v15 = vsel %vm1003_vm3, %v992_v4, 0.0  ;;  %v1015_v25 = vsel %vm1003_vm3, %v993_v0, 0.0  ;;  %v1216_v26 = vsel %vm1003_vm3, %v1194_v3, 0.0 }
 0x114   : > { %v1165_v6 = vadd.f32 %v3695_v2, %v4526_v63  ;;  %v956_v7 = vpop.f32.mrb[9].mxu0  ;;  %v1156_v8 = vpop.f32.mrb[9].mxu1  ;;  %v1212_v16 = vsel %vm1003_vm3, %v1192_v5, 0.0  ;;  %v965_v17 = vadd.f32 %v3673_v1, %v4526_v63  ;;  %v1014_v20 = vadd.f32 %v1013_v15, %v1012_v58 }
 0x115   : > { %v957_v10 = vadd.f32 %v4526_v63, %v956_v7  ;;  %v1157_v11 = vadd.f32 %v4526_v63, %v1156_v8  ;;  %v3674_v12 = vpop.f32.mrb[10].mxu0  ;;  %v3696_v13 = vpop.f32.mrb[10].mxu1  ;;  %v1213_v21 = vadd.f32 %v1212_v16, %v1211_v59  ;;  %v1017_v29 = vsel %vm1003_vm3, %v994_v9, 0.0  ;;  %v3443_v9 = vld [vmem:[%s5111_s0] ss:$0 sm:$0xff]  ;;  %s5114_s0 = sld [smem:[#allocation17_spill]] }
 0x116   : > { %v959_v18 = vpop.f32.mrb[11].mxu0  ;;  %v1159_v19 = vpop.f32.mrb[11].mxu1  ;;  %v1197_v27 = vmax.f32 %v1165_v6, 0.0  ;;  %v1168_v28 = vadd.f32 %v3696_v13, %v4526_v63  ;;  %v1016_v30 = vadd.f32 %v1015_v25, %v1014_v20  ;;  %v968_v32 = vadd.f32 %v3674_v12, %v4526_v63 }
 0x117   : > { %v995_v23 = vmax.f32 %v957_v10, 0.0  ;;  %v1195_v24 = vmax.f32 %v1157_v11, 0.0  ;;  %v1215_v31 = vadd.f32 %v1214_v14, %v1213_v21  ;;  %v960_v35 = vadd.f32 %v4526_v63, %v959_v18 }
 0x118   : > { %v1160_v36 = vadd.f32 %v4526_v63, %v1159_v19  ;;  %v997_v37 = vmax.f32 %v965_v17, 0.0  ;;  %v1018_v38 = vadd.f32 %v1017_v29, %v1016_v30  ;;  %v1198_v40 = vmax.f32 %v1168_v28, 0.0  ;;  %v1332_v19 = vld [vmem:[%s5112_s29] sm:$0xff]  ;;  %v1333_v30 = vld [vmem:[%s5112_s29 + $0x8] sm:$0xff] }
 0x119   : > { %v1019_v33 = vsel %vm1003_vm3, %v995_v23, 0.0  ;;  %v1218_v34 = vsel %vm1003_vm3, %v1195_v24, 0.0  ;;  %v1217_v39 = vadd.f32 %v1216_v26, %v1215_v31  ;;  %v1222_v43 = vsel %vm1003_vm3, %v1197_v27, 0.0 }
 0x11a   : > { %v996_v44 = vmax.f32 %v960_v35, 0.0  ;;  %v1196_v45 = vmax.f32 %v1160_v36, 0.0  ;;  %v1020_v48 = vadd.f32 %v1019_v33, %v1018_v38  ;;  %v998_v50 = vmax.f32 %v968_v32, 0.0 }
 0x11b   : > { %v3677_v41 = vpop.f32.mrb[12].mxu0  ;;  %v3699_v42 = vpop.f32.mrb[12].mxu1  ;;  %v1219_v49 = vadd.f32 %v1218_v34, %v1217_v39  ;;  %v1023_v60 = vsel %vm1003_vm3, %v997_v37, 0.0  ;;  %v1224_v62 = vsel %vm1003_vm3, %v1198_v40, 0.0 }
 0x11c   : > { %v972_v46 = vpop.f32.mrb[13].mxu0  ;;  %v1172_v47 = vpop.f32.mrb[13].mxu1  ;;  %v1181_v51 = vadd.f32 %v3699_v42, %v4526_v63  ;;  %v1021_v54 = vsel %vm1003_vm3, %v996_v44, 0.0  ;;  %v1220_v55 = vsel %vm1003_vm3, %v1196_v45, 0.0  ;;  %v981_v2 = vadd.f32 %v3677_v41, %v4526_v63 }
 0x11d   : > { %v3678_v52 = vpop.f32.mrb[14].mxu0  ;;  %v3700_v53 = vpop.f32.mrb[14].mxu1  ;;  %v973_v56 = vadd.f32 %v4526_v63, %v972_v46  ;;  %v1173_v57 = vadd.f32 %v4526_v63, %v1172_v47  ;;  %v1022_v0 = vadd.f32 %v1021_v54, %v1020_v48  ;;  %v1221_v1 = vadd.f32 %v1220_v55, %v1219_v49 }
 0x11e   : > { %v975_v58 = vpop.f32.mrb[15].mxu0  ;;  %v1175_v59 = vpop.f32.mrb[15].mxu1  ;;  %v1184_v5 = vadd.f32 %v3700_v53, %v4526_v63  ;;  %v1025_v6 = vsel %vm1003_vm3, %v998_v50, 0.0  ;;  %v1201_v10 = vmax.f32 %v1181_v51, 0.0  ;;  %v984_v13 = vadd.f32 %v3678_v52, %v4526_v63 }
 0x11f   : > { %v999_v3 = vmax.f32 %v973_v56, 0.0  ;;  %v1199_v4 = vmax.f32 %v1173_v57, 0.0  ;;  %v1024_v7 = vadd.f32 %v1023_v60, %v1022_v0  ;;  %v1223_v8 = vadd.f32 %v1222_v43, %v1221_v1 }
 0x120   : > { %v976_v16 = vadd.f32 %v4526_v63, %v975_v58  ;;  %v1176_v17 = vadd.f32 %v4526_v63, %v1175_v59  ;;  %v1001_v20 = vmax.f32 %v981_v2, 0.0  ;;  %v1202_v21 = vmax.f32 %v1184_v5, 0.0  ;;  %v1352_v2 = vpop.xlane.xlu1 %1351 }
 0x121   : > { %v1027_v11 = vsel %vm1003_vm3, %v999_v3, 0.0  ;;  %v1226_v12 = vsel %vm1003_vm3, %v1199_v4, 0.0  ;;  %v1026_v14 = vadd.f32 %v1025_v6, %v1024_v7  ;;  %v1225_v15 = vadd.f32 %v1224_v62, %v1223_v8 }
 0x122   : > { %v1000_v27 = vmax.f32 %v976_v16, 0.0  ;;  %v1200_v28 = vmax.f32 %v1176_v17, 0.0  ;;  %v1230_v33 = vsel %vm1003_vm3, %v1201_v10, 0.0  ;;  %v1002_v34 = vmax.f32 %v984_v13, 0.0  ;;  %v4068_v17 = vld [vmem:[%s5113_s6 + $0x8] sm:$0xff]  }
 0x123   : > { %v1321_v18 = vpop.f32.mrb[16].mxu0  ;;  %v1028_v25 = vadd.f32 %v1027_v11, %v1026_v14  ;;  %v1227_v26 = vadd.f32 %v1226_v12, %v1225_v15  ;;  %v1031_v40 = vsel %vm1003_vm3, %v1001_v20, 0.0  ;;  %v1232_v41 = vsel %vm1003_vm3, %v1202_v21, 0.0 }
 0x124   : > { %v1322_v23 = vadd.f32 %v3443_v9, %v1321_v18  ;;  %v3711_v24 = vpop.f32.mrb[17].mxu0  ;;  %v1029_v35 = vsel %vm1003_vm3, %v1000_v27, 0.0  ;;  %v1228_v36 = vsel %vm1003_vm3, %v1200_v28, 0.0  ;;  %v1033_v44 = vsel %vm1003_vm3, %v1002_v34, 0.0 }
 0x125   : > { %v1324_v29 = vpop.f32.mrb[18].mxu0  ;;  %v1030_v37 = vadd.f32 %v1029_v35, %v1028_v25  ;;  %v1229_v38 = vadd.f32 %v1228_v36, %v1227_v26  ;;  %v1356_v3 = vmul.f32 0.03125, %v1352_v2  ;;  %v3450_v36 = vld [vmem:[%s5115_s1] ss:$0 sm:$0xff]  ;;  %s4223_s1 = smov 96  }
 0x126   : > { %v1334_v31 = vadd.f32 %v1332_v19, %v1322_v23  ;;  %v1325_v63 = vadd.f32 %v3443_v9, %v1324_v29  ;;  %v3712_v32 = vpop.f32.mrb[19].mxu0 }
 0x127   : > { %v1032_v42 = vadd.f32 %v1031_v40, %v1030_v37  ;;  %v1231_v43 = vadd.f32 %v1230_v33, %v1229_v38  ;;  %v1359_v6 = vsub.f32 %v4519_v61, %v1356_v3  ;;  %v4067_v61 = vld [vmem:[%s5113_s6] sm:$0xff]  }
 0x128   : > { %1336 = vst.msk [vmem:[#allocation2] sm:$0xff] %vm1328_vm4, %v1334_v31  ;;  %v1335_v39 = vadd.f32 %v1333_v30, %v1325_v63  ;;  %3713 = vmatprep.subr.bf16.mxu1 %v4067_v61  ;;  %v3449_v30 = vld [vmem:[%s5114_s0] ss:$0 sm:$0xff]  ;;  %s4224_s0 = smov 64  }
 0x129   : > { %v1034_v45 = vadd.f32 %v1033_v44, %v1032_v42  ;;  %v1233_v46 = vadd.f32 %v1232_v41, %v1231_v43  ;;  %v1362_v11 = vmul.f32 %v1359_v6, %v1359_v6  ;;  %3714 = vmatpush3.bf16.msra.mxu1 %v4067_v61  ;;  %v3451_v43 = vld [vmem:[%s5116_s11] ss:$0 sm:$0xff]  ;;  %v4222_v44 = vmov 0.0|0.0  }
 0x12a   : > { %1337 = vst.msk [vmem:[#allocation2 + $0x8] sm:$0xff] %vm1328_vm4, %v1335_v39  ;;  %3715 = vmatprep.subr.bf16.mxu1 %v4068_v17  ;;  %3937 = vmatprep.subr.bf16.mxu0 %v4222_v44 }
 0x12b   : > { %v1035_v47 = vrot.slane %v1034_v45, 4  ;;  %v1234_v48 = vrot.slane %v1233_v46, 4  ;;  %v1369_v14 = vsel %vm1328_vm4, %v1362_v11, 0.0 }
 0x12d   : > { %v1036_v50 = vadd.f32 %v1035_v47, %v1034_v45  ;;  %v1235_v51 = vadd.f32 %v1234_v48, %v1233_v46  ;;  %3716 = vmatpush3.bf16.msra.mxu1 %v4068_v17 }
 0x12e   : > { %3941 = vmatprep.subr.bf16.mxu1 %v4222_v44 }
 0x12f   : > { %v1341_v49 = vld [vmem:[#allocation2] sm:$0xff]  ;;  %v1037_v54 = vrot.slane %v1036_v50, 2  ;;  %v1236_v55 = vrot.slane %v1235_v51, 2 }
 0x130   : > { %v1344_v52 = vsel %vm1328_vm4, %v1341_v49, 0.0 }
 0x131   : > { %1345 = vadd.xlane.f32.xlu0 %v1344_v52  ;;  %v1342_v53 = vld [vmem:[#allocation2 + $0x8] sm:$0xff]  ;;  %v1038_v56 = vadd.f32 %v1037_v54, %v1036_v50  ;;  %v1237_v57 = vadd.f32 %v1236_v55, %v1235_v51 }
 0x132   : > { %v1347_v58 = vsel %vm1328_vm4, %v1342_v53, 0.0 }
 0x133   : > { %v1039_v59 = vrot.slane %v1038_v56, 1  ;;  %v1238_v60 = vrot.slane %v1237_v57, 1 }
 0x135   : > { %1348 = vadd.xlane.f32.xlu0 %v1347_v58  ;;  %v1040_v62 = vadd.f32 %v1039_v59, %v1038_v56  ;;  %v1239_v0 = vadd.f32 %v1238_v60, %v1237_v57  ;;  %v1483_v59 = vlaneseq }
 0x137   : > { %v4605_v1 = vadd.f32 %v1239_v0, %v1040_v62  ;;  %v4667_v60 = vand.u32 127, %v1483_v59 }
 0x139   : > { %vm1485_vm8 = vcmp.lt.s32.totalorder %v4667_v60, 17 }
 0x1be   : > { %v1346_v4 = vpop.xlane.xlu0 %1345 }
 0x1bf   : > { %v1354_v5 = vmul.f32 0.03125, %v1346_v4 }
 0x1c1   : > { %v1357_v7 = vsub.f32 %v1341_v49, %v1354_v5 }
 0x1c2   : > { %v1349_v8 = vpop.xlane.xlu0 %1348 }
 0x1c3   : > { %v1355_v9 = vmul.f32 0.03125, %v1349_v8  ;;  %v1360_v10 = vmul.f32 %v1357_v7, %v1357_v7 }
 0x1c5   : > { %v1358_v12 = vsub.f32 %v1342_v53, %v1355_v9  ;;  %v1363_v13 = vsel %vm1328_vm4, %v1360_v10, 0.0 }
 0x1c6   : > { %1364 = vadd.xlane.f32.xlu1 %v1363_v13 }
 0x1c7   : > { %v1361_v15 = vmul.f32 %v1358_v12, %v1358_v12 }
 0x1c9   : > { %v1366_v16 = vsel %vm1328_vm4, %v1361_v15, 0.0 }
 0x1ca   : > { %1370 = vadd.xlane.f32.xlu1 %v1369_v14  ;;  %1367 = vadd.xlane.f32.xlu0 %v1366_v16 }
 0x253   : > { %v1365_v18 = vpop.xlane.xlu1 %1364 }
 0x254   : > { %v1372_v19 = vmul.f32 0.03125, %v1365_v18 }
 0x256   : > { %v1375_v20 = vadd.f32 1e-06, %v1372_v19 }
 0x257   : > { %v1371_v21 = vpop.xlane.xlu1 %1370  ;;  %v1368_v23 = vpop.xlane.xlu0 %1367 }
 0x258   : > { %4085 = vrsqrt.f32 %v1375_v20  ;;  %v1374_v24 = vmul.f32 0.03125, %v1371_v21  ;;  %v1373_v25 = vmul.f32 0.03125, %v1368_v23 }
 0x25a   : > { %v1377_v26 = vadd.f32 1e-06, %v1374_v24  ;;  %v1376_v27 = vadd.f32 1e-06, %v1373_v25 }
 0x25c   : > { %4087 = vrsqrt.f32 %v1377_v26 }
 0x25d   : > { %4089 = vrsqrt.f32 %v1376_v27 }
 0x262   : > { %v4086_v28 = vpop.eup %4085 }
 0x263   : > { %v1381_v29 = vmul.f32 %v4086_v28, %v1357_v7 }
 0x265   : > { %v1391_v34 = vmul.f32 %v3449_v30, %v1381_v29 }
 0x266   : > { %v4088_v31 = vpop.eup %4087 }
 0x267   : > { %v4090_v63 = vpop.eup %4089  ;;  %v1383_v32 = vmul.f32 %v4088_v31, %v1359_v6  ;;  %v1401_v39 = vadd.f32 %v3450_v36, %v1391_v34 }
 0x268   : > { %v1382_v33 = vmul.f32 %v4090_v63, %v1358_v12 }
 0x269   : > { %v1393_v35 = vmul.f32 %v3449_v30, %v1383_v32 }
 0x26a   : > { %v1392_v37 = vmul.f32 %v3449_v30, %v1382_v33 }
 0x26b   : > { %v1403_v38 = vadd.f32 %v3450_v36, %v1393_v35 }
 0x26c   : > { %v1402_v40 = vadd.f32 %v3450_v36, %v1392_v37 }
 0x26d   : > { %v1409_v41 = vpack.c.bf16 %v1403_v38, %v1403_v38 }
 0x26e   : > { %v1408_v42 = vpack.c.bf16 %v1402_v40, %v1401_v39 }
 0x270   : > { %3717 = vmatprep.mubr.msk.bf16.mxu1 %vm1328_vm4, %v1408_v42 }
 0x271   : > { %3718 = vmatmul.mubr.msk.bf16.vlgmr.msra.gmra.mrb[16].mxu1 %vm1328_vm4, %v1409_v41 }
 0x272   : > { %3742 = vmatprep.mubr.msk.f32.mxu1 %vm4221_vm2, %v4220_v22 }
 0x344   : > { %v3719_v45 = vpop.f32.mrb[16].mxu1 }
 0x345   : > { %v4632_v46 = vadd.f32 %v3719_v45, %v3451_v43  ;;  %v1469_v47 = vpop.f32.mrb[17].mxu1 }
 0x346   : > { %v3720_v48 = vpop.f32.mrb[18].mxu1  ;;  %v4635_v50 = vadd.f32 %v3451_v43, %v1469_v47 }
 0x347   : > { %1493 = vrot.lane.b32.xlu1 %v4632_v46, %s4223_s1  ;;  %v1472_v49 = vpop.f32.mrb[19].mxu1 }
 0x348   : > { %v4637_v51 = vadd.f32 %v3451_v43, %v1472_v49 }
 0x34a   : > { %v4641_v52 = vpack.i.bf16 %v4637_v51, %v4635_v50 }
 0x34c   : > { %4021 = vrot.lane.b32.xlu0 %v4641_v52, %s4223_s1  ;;  %s4229_s1 = smov 112  }
 0x3b9   : > { %v1494_v58 = vpop.permute.xlu1 %1493 }
 0x3be   : > { %v4022_v53 = vpop.permute.xlu0 %4021 }
 0x3bf   : > { %v4024_v54 = vunpack.i.h.bf16 %v4022_v53  ;;  %v4023_v55 = vunpack.i.l.bf16 %v4022_v53 }
 0x3c1   : > { %v3938_v57 = vpack.c.bf16 %v4024_v54, %v4023_v55 }
 0x3c3   : > { %3940 = vmatpush3.bf16.xpose.msk.msra.mxu0 %vm4646_vm7, %v3938_v57 }
 0x3c4   : > { %3725 = vmatprep.subr.mxu0 %v4220_v22 }
 0x3cb   : > { %3726 = vmatpush3.xpose.msk.msra.mxu0 %vm1495_vm6, %v1494_v58 }
 0x3cc   : > { %3948 = vmatprep.subr.bf16.mxu0 %v4222_v44 }
 0x3ce   : > { %3728 = vmatmul.mubr.msk.f32.vlgmr.msra.gmra.mrb[20].mxu0 %vm1495_vm6, %v4635_v50 }
 0x3cf   : > { %3730 = vmatprep.mubr.msk.f32.mxu0 %vm4221_vm2, %v4220_v22 }
 0x3d2   : > { %3731 = vmatmul.mubr.msk.f32.gmra.mrb[22].mxu0 %vm1495_vm6, %v4637_v51 }
 0x3d3   : > { %3733 = vmatprep.mubr.msk.f32.mxu0 %vm4221_vm2, %v4220_v22 }
 0x3d6   : > { %3734 = vmatmul.mubr.msk.f32.gmra.mrb[24].mxu0 %vm1495_vm6, %v4632_v46 }
 0x3d7   : > { %3772 = vmatprep.mubr.msk.f32.mxu0 %vm4221_vm2, %v4220_v22 }
 0x4a1   : > { %v1574_v62 = vpop.f32.mrb[20].mxu0 }
 0x4a2   : > { %v1588_v0 = vmul.f32 0.35355338, %v1574_v62  ;;  %v3729_v2 = vpop.f32.mrb[21].mxu0 }
 0x4a4   : > { %v1591_v3 = vsel %vm1485_vm8, %v1588_v0, -1e+30 }
 0x4a5   : > { %v1579_v4 = vpop.f32.mrb[22].mxu0  ;;  %v1595_v5 = vsel %vm1594_vm9, %v1591_v3, -inf }
 0x4a6   : > { %v1589_v6 = vmul.f32 0.35355338, %v1579_v4  ;;  %1596 = vmax.xlane.f32.xlu1 %v1595_v5  ;;  %v3732_v7 = vpop.f32.mrb[23].mxu0 }
 0x4a8   : > { %v1592_v8 = vsel %vm1485_vm8, %v1589_v6, -1e+30 }
 0x4a9   : > { %v1584_v9 = vpop.f32.mrb[24].mxu0  ;;  %v1598_v10 = vsel %vm1594_vm9, %v1592_v8, -inf }
 0x4aa   : > { %v1590_v11 = vmul.f32 0.35355338, %v1584_v9  ;;  %1599 = vmax.xlane.f32.xlu0 %v1598_v10  ;;  %v3735_v12 = vpop.f32.mrb[25].mxu0 }
 0x4ac   : > { %v1593_v13 = vsel %vm1485_vm8, %v1590_v11, -1e+30 }
 0x4ad   : > { %v1601_v14 = vsel %vm1594_vm9, %v1593_v13, -inf }
 0x4ae   : > { %1602 = vmax.xlane.f32.xlu0 %v1601_v14 }
 0x533   : > { %v1597_v15 = vpop.xlane.xlu1 %1596 }
 0x534   : > { %v1604_v16 = vsub.f32 %v1591_v3, %v1597_v15 }
 0x536   : > { %v1607_v61 = vmul.f32 1.442695, %v1604_v16 }
 0x537   : > { %v1600_v17 = vpop.xlane.xlu0 %1599 }
 0x538   : > { %4091 = vpow2.f32 %v1607_v61  ;;  %v1605_v18 = vsub.f32 %v1592_v8, %v1600_v17 }
 0x53a   : > { %v1609_v19 = vmul.f32 1.442695, %v1605_v18 }
 0x53b   : > { %v1603_v25 = vpop.xlane.xlu0 %1602 }
 0x53c   : > { %4093 = vpow2.f32 %v1609_v19  ;;  %v1606_v26 = vsub.f32 %v1593_v13, %v1603_v25 }
 0x53e   : > { %v1611_v27 = vmul.f32 1.442695, %v1606_v26 }
 0x540   : > { %4095 = vpow2.f32 %v1611_v27 }
 0x542   : > { %v4092_v20 = vpop.eup %4091 }
 0x543   : > { %v1613_v21 = vsel %vm1594_vm9, %v4092_v20, 0.0 }
 0x544   : > { %1614 = vadd.xlane.f32.xlu1 %v1613_v21 }
 0x546   : > { %v4094_v23 = vpop.eup %4093 }
 0x547   : > { %v1616_v24 = vsel %vm1594_vm9, %v4094_v23, 0.0 }
 0x548   : > { %1617 = vadd.xlane.f32.xlu0 %v1616_v24 }
 0x54a   : > { %v4096_v28 = vpop.eup %4095 }
 0x54b   : > { %v1619_v29 = vsel %vm1594_vm9, %v4096_v28, 0.0 }
 0x555   : > { %1632 = vrot.lane.b32.xlu1 %v4632_v46, %s4224_s0 }
 0x559   : > { %4031 = vrot.lane.b32.xlu1 %v4641_v52, %s4225_s4 }
 0x55d   : > { %1737 = vrot.lane.b32.xlu1 %v4632_v46, %s4225_s4 }
 0x55e   : > { %4026 = vrot.lane.b32.xlu0 %v4641_v52, %s4224_s0  ;;  %s4232_s0 = smov 104  }
 0x562   : > { %1727 = vrot.lane.b32.xlu0 %v4635_v50, %s4226_s30 }
 0x566   : > { %1731 = vrot.lane.b32.xlu0 %v4632_v46, %s4226_s30 }
 0x581   : > { %1620 = vadd.xlane.f32.xlu1 %v1619_v29 }
 0x592   : > { %1729 = vrot.lane.b32.xlu1 %v4637_v51, %s4226_s30  ;;  %s797_s30 = sand.u32 1, %s4210_s3  }
 0x593   : > { %s798_s9 = scalar_lea.vmem [#allocation3], %s797_s30 }
 0x594   : > { %s3348_s6 = sshll.u32 %s798_s9, 4  ;;  %s5010_s6 = int_to_ptr.vmem [resolvable:$true] %s3348_s6 }
 0x5d1   : > { %v1615_v30 = vpop.xlane.xlu1 %1614 }
 0x5d2   : > { %4097 = vrcp.f32 %v1615_v30 }
 0x5d5   : > { %v1618_v31 = vpop.xlane.xlu0 %1617  ;;  %v1633_v32 = vpop.permute.xlu1 %1632 }
 0x5d6   : > { %4099 = vrcp.f32 %v1618_v31 }
 0x5d9   : > { %v4027_v63 = vpop.permute.xlu0 %4026  ;;  %v4032_v37 = vpop.permute.xlu1 %4031 }
 0x5da   : > { %v4029_v33 = vunpack.i.h.bf16 %v4027_v63  ;;  %v4028_v34 = vunpack.i.l.bf16 %v4027_v63  ;;  %v4034_v40 = vunpack.i.h.bf16 %v4032_v37  ;;  %v4033_v41 = vunpack.i.l.bf16 %v4032_v37 }
 0x5dc   : > { %v3942_v35 = vpack.c.bf16 %v4029_v33, %v4028_v34  ;;  %v4098_v36 = vpop.eup %4097  ;;  %v3945_v43 = vpack.c.bf16 %v4034_v40, %v4033_v41 }
 0x5dd   : > { %v1625_v38 = vmul.f32 %v4098_v36, %v4092_v20  ;;  %v1738_v45 = vpop.permute.xlu1 %1737  ;;  %v1728_v53 = vpop.permute.xlu0 %1727 }
 0x5de   : > { %3943 = vmatpush3.bf16.msra.mxu1 %v3942_v35 }
 0x5df   : > { %3740 = vmatprep.subr.mxu1 %v4220_v22 }
 0x5e0   : > { %v4100_v39 = vpop.eup %4099 }
 0x5e1   : > { %v1626_v42 = vmul.f32 %v4100_v39, %v4094_v23  ;;  %v1732_v55 = vpop.permute.xlu0 %1731 }
 0x5e2   : > { %3741 = vmatpush3.msra.mxu1 %v1633_v32  ;;  %v1968_v32 = vld [vmem:[%s5119_s12 + $0x8] sm:$0xff] }
 0x5e3   : > { %3743 = vmatmul.mubr.msk.f32.vlgmr.msra.gmra.mrb[20].mxu1 %vm1594_vm9, %v1625_v38  ;;  %3944 = vmatprep.subr.bf16.mxu1 %v4222_v44 }
 0x5e4   : > { %3745 = vmatprep.mubr.msk.f32.mxu1 %vm4221_vm2, %v4220_v22 }
 0x5e7   : > { %3746 = vmatmul.mubr.msk.f32.gmra.mrb[22].mxu1 %vm1594_vm9, %v1626_v42 }
 0x5e8   : > { %3748 = vmatprep.mubr.msk.f32.mxu1 %vm4221_vm2, %v4220_v22 }
 0x5e9   : > { %3947 = vmatpush3.bf16.xpose.msk.msra.mxu1 %vm4646_vm7, %v3945_v43  ;;  %v1726_v43 = vld [vmem:[%s5119_s12] sm:$0xff] }
 0x5ea   : > { %3755 = vmatprep.subr.mxu1 %v4220_v22 }
 0x5f1   : > { %3756 = vmatpush3.xpose.msk.msra.mxu1 %vm1495_vm6, %v1738_v45 }
 0x5f2   : > { %3781 = vmatprep.subr.mxu1 %v4220_v22 }
 0x60e   : > { %v1621_v47 = vpop.xlane.xlu1 %1620 }
 0x60f   : > { %4101 = vrcp.f32 %v1621_v47 }
 0x612   : > { %v1730_v54 = vpop.permute.xlu1 %1729 }
 0x619   : > { %v4102_v48 = vpop.eup %4101 }
 0x61a   : > { %v1627_v49 = vmul.f32 %v4102_v48, %v4096_v28 }
 0x61c   : > { %3749 = vmatmul.mubr.msk.f32.gmra.mrb[24].mxu1 %vm1594_vm9, %v1627_v49 }
 0x61d   : > { %3757 = vmatprep.mubr.msk.f32.mxu1 %vm4221_vm2, %v4220_v22 }
 0x620   : > { %3758 = vmatmul.mubr.msk.f32.vlgmr.msra.gmra.mrb[26].mxu1 %vm1495_vm6, %v1728_v53 }
 0x621   : > { %3760 = vmatprep.mubr.msk.f32.mxu1 %vm4221_vm2, %v4220_v22  ;;  %3782 = vmatpush3.msra.mxu1 %v1968_v32 }
 0x622   : > { %3951 = vmatprep.subr.bf16.mxu1 %v4222_v44 }
 0x624   : > { %3761 = vmatmul.mubr.msk.f32.gmra.mrb[28].mxu1 %vm1495_vm6, %v1730_v54 }
 0x625   : > { %3763 = vmatprep.mubr.msk.f32.mxu1 %vm4221_vm2, %v4220_v22 }
 0x628   : > { %3764 = vmatmul.mubr.msk.f32.gmra.mrb[30].mxu1 %vm1495_vm6, %v1732_v55 }
 0x629   : > { %3783 = vmatprep.mubr.msk.f32.mxu1 %vm4221_vm2, %v4220_v22 }
 0x6b6   : > { %v4714_v57 = vpop.f32.mrb[20].mxu1 }
 0x6b7   : > { %v3744_v58 = vpop.f32.mrb[21].mxu1 }
 0x6ba   : > { %v4716_v59 = vpop.f32.mrb[22].mxu1 }
 0x6bb   : > { %v3747_v62 = vpop.f32.mrb[23].mxu1 }
 0x6ef   : > { %v4718_v0 = vpop.f32.mrb[24].mxu1 }
 0x6f0   : > { %v3750_v2 = vpop.f32.mrb[25].mxu1 }
 0x6f3   : > { %v1817_v3 = vpop.f32.mrb[26].mxu1 }
 0x6f4   : > { %v1831_v4 = vmul.f32 0.35355338, %v1817_v3  ;;  %v3759_v5 = vpop.f32.mrb[27].mxu1 }
 0x6f6   : > { %v1834_v6 = vsel %vm1485_vm8, %v1831_v4, -1e+30 }
 0x6f7   : > { %v1822_v7 = vpop.f32.mrb[28].mxu1  ;;  %v1837_v8 = vsel %vm1594_vm9, %v1834_v6, -inf }
 0x6f8   : > { %v1832_v9 = vmul.f32 0.35355338, %v1822_v7  ;;  %1838 = vmax.xlane.f32.xlu1 %v1837_v8  ;;  %v3762_v10 = vpop.f32.mrb[29].mxu1 }
 0x6fa   : > { %v1835_v11 = vsel %vm1485_vm8, %v1832_v9, -1e+30 }
 0x6fb   : > { %v1827_v12 = vpop.f32.mrb[30].mxu1  ;;  %v1840_v13 = vsel %vm1594_vm9, %v1835_v11, -inf }
 0x6fc   : > { %v1833_v14 = vmul.f32 0.35355338, %v1827_v12  ;;  %1841 = vmax.xlane.f32.xlu0 %v1840_v13  ;;  %v3765_v15 = vpop.f32.mrb[31].mxu1 }
 0x6fe   : > { %v1836_v16 = vsel %vm1485_vm8, %v1833_v14, -1e+30 }
 0x6ff   : > { %v1843_v61 = vsel %vm1594_vm9, %v1836_v16, -inf }
 0x700   : > { %1844 = vmax.xlane.f32.xlu0 %v1843_v61 }
 0x785   : > { %v1839_v17 = vpop.xlane.xlu1 %1838 }
 0x786   : > { %v1846_v18 = vsub.f32 %v1834_v6, %v1839_v17 }
 0x788   : > { %v1849_v19 = vmul.f32 1.442695, %v1846_v18 }
 0x789   : > { %v1842_v20 = vpop.xlane.xlu0 %1841 }
 0x78a   : > { %4103 = vpow2.f32 %v1849_v19  ;;  %v1847_v21 = vsub.f32 %v1835_v11, %v1842_v20 }
 0x78c   : > { %v1851_v23 = vmul.f32 1.442695, %v1847_v21 }
 0x78d   : > { %v1845_v24 = vpop.xlane.xlu0 %1844 }
 0x78e   : > { %4105 = vpow2.f32 %v1851_v23  ;;  %v1848_v25 = vsub.f32 %v1836_v16, %v1845_v24 }
 0x790   : > { %v1853_v26 = vmul.f32 1.442695, %v1848_v25 }
 0x792   : > { %4107 = vpow2.f32 %v1853_v26 }
 0x794   : > { %v4104_v27 = vpop.eup %4103 }
 0x795   : > { %v1855_v28 = vsel %vm1594_vm9, %v4104_v27, 0.0 }
 0x796   : > { %1856 = vadd.xlane.f32.xlu0 %v1855_v28 }
 0x798   : > { %v4106_v29 = vpop.eup %4105 }
 0x799   : > { %v1858_v30 = vsel %vm1594_vm9, %v4106_v29, 0.0 }
 0x79a   : > { %1859 = vadd.xlane.f32.xlu1 %v1858_v30 }
 0x79c   : > { %v4108_v31 = vpop.eup %4107 }
 0x79d   : > { %v1861_v63 = vsel %vm1594_vm9, %v4108_v31, 0.0 }
 0x79e   : > { %1862 = vadd.xlane.f32.xlu0 %v1861_v63 }
 0x7ab   : > { %4036 = vrot.lane.b32.xlu1 %v4641_v52, %s4227_s10 }
 0x7af   : > { %4041 = vrot.lane.b32.xlu1 %v4641_v52, %s4228_s7 }
 0x7b3   : > { %2157 = vrot.lane.b32.xlu1 %v4632_v46, %s4228_s7  ;;  %s4230_s7 = smov 48  }
 0x7b4   : > { %1874 = vrot.lane.b32.xlu0 %v4632_v46, %s4227_s10  ;;  %s4233_s10 = smov 40  }
 0x7b7   : > { %2147 = vrot.lane.b32.xlu1 %v4635_v50, %s4229_s1 }
 0x7b8   : > { %2149 = vrot.lane.b32.xlu0 %v4637_v51, %s4229_s1 }
 0x7bb   : > { %2151 = vrot.lane.b32.xlu1 %v4632_v46, %s4229_s1  ;;  %s4231_s1 = smov 72  }
 0x823   : > { %v1857_v33 = vpop.xlane.xlu0 %1856 }
 0x824   : > { %4109 = vrcp.f32 %v1857_v33 }
 0x827   : > { %v1860_v34 = vpop.xlane.xlu1 %1859 }
 0x828   : > { %4111 = vrcp.f32 %v1860_v34 }
 0x82b   : > { %v4037_v35 = vpop.permute.xlu1 %4036  ;;  %v1863_v36 = vpop.xlane.xlu0 %1862 }
 0x82c   : > { %v4039_v37 = vunpack.i.h.bf16 %v4037_v35  ;;  %v4038_v38 = vunpack.i.l.bf16 %v4037_v35  ;;  %4113 = vrcp.f32 %v1863_v36 }
 0x82e   : > { %v3949_v39 = vpack.c.bf16 %v4039_v37, %v4038_v38  ;;  %v4110_v40 = vpop.eup %4109 }
 0x82f   : > { %v1867_v41 = vmul.f32 %v4110_v40, %v4104_v27  ;;  %v1875_v42 = vpop.permute.xlu0 %1874  ;;  %v4042_v53 = vpop.permute.xlu1 %4041 }
 0x830   : > { %3950 = vmatpush3.bf16.msra.mxu0 %v3949_v39  ;;  %v4044_v54 = vunpack.i.h.bf16 %v4042_v53  ;;  %v4043_v55 = vunpack.i.l.bf16 %v4042_v53 }
 0x831   : > { %3770 = vmatprep.subr.mxu0 %v4220_v22 }
 0x832   : > { %v4112_v45 = vpop.eup %4111  ;;  %v3952_v58 = vpack.c.bf16 %v4044_v54, %v4043_v55 }
 0x833   : > { %v1868_v47 = vmul.f32 %v4112_v45, %v4106_v29  ;;  %v2158_v2 = vpop.permute.xlu1 %2157  ;;  %v2150_v8 = vpop.permute.xlu0 %2149 }
 0x834   : > { %3771 = vmatpush3.msra.mxu0 %v1875_v42 }
 0x835   : > { %3773 = vmatmul.mubr.msk.f32.vlgmr.msra.gmra.mrb[26].mxu0 %vm1594_vm9, %v1867_v41  ;;  %3792 = vmatprep.subr.mxu0 %v4220_v22 }
 0x836   : > { %3775 = vmatprep.mubr.msk.f32.mxu0 %vm4221_vm2, %v4220_v22  ;;  %3793 = vmatpush3.msra.mxu0 %v1726_v43  ;;  %v4114_v48 = vpop.eup %4113 }
 0x837   : > { %3955 = vmatprep.subr.bf16.mxu0 %v4222_v44  ;;  %v1869_v49 = vmul.f32 %v4114_v48, %v4108_v31  ;;  %v2148_v5 = vpop.permute.xlu1 %2147 }
 0x839   : > { %3776 = vmatmul.mubr.msk.f32.gmra.mrb[28].mxu0 %vm1594_vm9, %v1868_v47 }
 0x83a   : > { %3778 = vmatprep.mubr.msk.f32.mxu0 %vm4221_vm2, %v4220_v22 }
 0x83b   : > { %v2152_v11 = vpop.permute.xlu1 %2151 }
 0x83d   : > { %3779 = vmatmul.mubr.msk.f32.gmra.mrb[30].mxu0 %vm1594_vm9, %v1869_v49 }
 0x83e   : > { %3794 = vmatprep.mubr.msk.f32.mxu0 %vm4221_vm2, %v4220_v22 }
 0x841   : > { %3795 = vmatmul.mubr.msk.f32.vlgmr.msra.gmra.mrb[32].mxu0 %vm1495_vm6, %v4714_v57 }
 0x842   : > { %3797 = vmatprep.mubr.msk.f32.mxu0 %vm4221_vm2, %v4220_v22 }
 0x845   : > { %3798 = vmatmul.mubr.msk.f32.gmra.mrb[34].mxu0 %vm1495_vm6, %v4716_v59 }
 0x846   : > { %3800 = vmatprep.mubr.msk.f32.mxu0 %vm4221_vm2, %v4220_v22 }
 0x849   : > { %3801 = vmatmul.mubr.msk.f32.gmra.mrb[36].mxu0 %vm1495_vm6, %v4718_v0 }
 0x84a   : > { %3824 = vmatprep.mubr.msk.f32.mxu0 %vm4221_vm2, %v4220_v22 }
 0x908   : > { %v1954_v57 = vpop.f32.mrb[26].mxu0 }
 0x909   : > { %v3774_v62 = vpop.f32.mrb[27].mxu0  ;;  %3784 = vmatmul.mubr.msk.f32.vlgmr.msra.gmra.mrb[32].mxu1 %vm1495_vm6, %v1954_v57 }
 0x90a   : > { %3954 = vmatpush3.bf16.xpose.msk.msra.mxu1 %vm4646_vm7, %v3952_v58  ;;  %3786 = vmatprep.mubr.msk.f32.mxu1 %vm4221_vm2, %v4220_v22 }
 0x90b   : > { %3807 = vmatprep.subr.mxu1 %v4220_v22 }
 0x90c   : > { %v1959_v59 = vpop.f32.mrb[28].mxu0 }
 0x90d   : > { %v3777_v0 = vpop.f32.mrb[29].mxu0  ;;  %3787 = vmatmul.mubr.msk.f32.gmra.mrb[34].mxu1 %vm1495_vm6, %v1959_v59 }
 0x90e   : > { %3789 = vmatprep.mubr.msk.f32.mxu1 %vm4221_vm2, %v4220_v22 }
 0x910   : > { %v1964_v3 = vpop.f32.mrb[30].mxu0 }
 0x911   : > { %v3780_v4 = vpop.f32.mrb[31].mxu0  ;;  %3790 = vmatmul.mubr.msk.f32.gmra.mrb[36].mxu1 %vm1495_vm6, %v1964_v3 }
 0x912   : > { %3808 = vmatpush3.xpose.msk.msra.mxu1 %vm1495_vm6, %v2158_v2  ;;  %3809 = vmatprep.mubr.msk.f32.mxu1 %vm4221_vm2, %v4220_v22 }
 0x913   : > { %3833 = vmatprep.subr.mxu1 %v4220_v22 }
 0x914   : > { %v2133_v6 = vpop.f32.mrb[32].mxu0 }
 0x915   : > { %v3796_v7 = vpop.f32.mrb[33].mxu0  ;;  %3810 = vmatmul.mubr.msk.f32.vlgmr.msra.gmra.mrb[38].mxu1 %vm1495_vm6, %v2148_v5 }
 0x916   : > { %3812 = vmatprep.mubr.msk.f32.mxu1 %vm4221_vm2, %v4220_v22 }
 0x918   : > { %v2138_v9 = vpop.f32.mrb[34].mxu0 }
 0x919   : > { %v3799_v10 = vpop.f32.mrb[35].mxu0  ;;  %3813 = vmatmul.mubr.msk.f32.gmra.mrb[40].mxu1 %vm1495_vm6, %v2150_v8 }
 0x91a   : > { %3815 = vmatprep.mubr.msk.f32.mxu1 %vm4221_vm2, %v4220_v22 }
 0x91c   : > { %v2143_v12 = vpop.f32.mrb[36].mxu0 }
 0x91d   : > { %v3802_v13 = vpop.f32.mrb[37].mxu0  ;;  %3816 = vmatmul.mubr.msk.f32.gmra.mrb[42].mxu1 %vm1495_vm6, %v2152_v11 }
 0x91e   : > { %3835 = vmatprep.mubr.msk.f32.mxu1 %vm4221_vm2, %v4220_v22 }
 0x9dc   : > { %v2044_v14 = vpop.f32.mrb[32].mxu1 }
 0x9dd   : > { %v4793_v15 = vadd.f32 %v2133_v6, %v2044_v14  ;;  %v3785_v16 = vpop.f32.mrb[33].mxu1 }
 0x9e0   : > { %v2049_v61 = vpop.f32.mrb[34].mxu1 }
 0x9e1   : > { %v4795_v17 = vadd.f32 %v2138_v9, %v2049_v61  ;;  %v3788_v18 = vpop.f32.mrb[35].mxu1 }
 0x9e2   : > { %v2388_v18 = vld [vmem:[%s5119_s12 + $0x10] sm:$0xff] }
 0x9e3   : > { %3834 = vmatpush3.msra.mxu1 %v2388_v18 }
 0x9e4   : > { %v2054_v19 = vpop.f32.mrb[36].mxu1  ;;  %3962 = vmatprep.subr.bf16.mxu1 %v4222_v44 }
 0x9e5   : > { %v4797_v20 = vadd.f32 %v2143_v12, %v2054_v19  ;;  %v3791_v21 = vpop.f32.mrb[37].mxu1 }
 0x9e8   : > { %v2237_v23 = vpop.f32.mrb[38].mxu1 }
 0x9e9   : > { %v2251_v24 = vmul.f32 0.35355338, %v2237_v23  ;;  %v3811_v25 = vpop.f32.mrb[39].mxu1 }
 0x9eb   : > { %v2254_v26 = vsel %vm1485_vm8, %v2251_v24, -1e+30 }
 0x9ec   : > { %v2242_v27 = vpop.f32.mrb[40].mxu1  ;;  %v2257_v28 = vsel %vm1594_vm9, %v2254_v26, -inf }
 0x9ed   : > { %v2252_v29 = vmul.f32 0.35355338, %v2242_v27  ;;  %2258 = vmax.xlane.f32.xlu0 %v2257_v28  ;;  %v3814_v30 = vpop.f32.mrb[41].mxu1 }
 0x9ef   : > { %v2255_v31 = vsel %vm1485_vm8, %v2252_v29, -1e+30 }
 0x9f0   : > { %v2247_v63 = vpop.f32.mrb[42].mxu1  ;;  %v2260_v32 = vsel %vm1594_vm9, %v2255_v31, -inf }
 0x9f1   : > { %v2253_v33 = vmul.f32 0.35355338, %v2247_v63  ;;  %2261 = vmax.xlane.f32.xlu1 %v2260_v32  ;;  %v3817_v34 = vpop.f32.mrb[43].mxu1 }
 0x9f3   : > { %v2256_v35 = vsel %vm1485_vm8, %v2253_v33, -1e+30 }
 0x9f4   : > { %v2263_v36 = vsel %vm1594_vm9, %v2256_v35, -inf }
 0x9f5   : > { %2264 = vmax.xlane.f32.xlu0 %v2263_v36 }
 0xa02   : > { %2294 = vrot.lane.b32.xlu1 %v4632_v46, %s4230_s7 }
 0xa06   : > { %4051 = vrot.lane.b32.xlu1 %v4641_v52, %s4231_s1 }
 0xa0a   : > { %2491 = vrot.lane.b32.xlu1 %v4632_v46, %s4231_s1  ;;  %s3534_s1 = sshll.u32 %s4391_s8, 4  ;;  %s3336_s8 = scalar_lea.sflag [#allocation4], %s797_s30 }
 0xa0b   : > { %s5008_s11 = scalar_lea.hbm %s5076_s26, %s3534_s1 }
 0xa7a   : > { %v2259_v37 = vpop.xlane.xlu0 %2258 }
 0xa7b   : > { %v2266_v38 = vsub.f32 %v2254_v26, %v2259_v37 }
 0xa7d   : > { %v2269_v39 = vmul.f32 1.442695, %v2266_v38 }
 0xa7e   : > { %v2262_v40 = vpop.xlane.xlu1 %2261 }
 0xa7f   : > { %4115 = vpow2.f32 %v2269_v39  ;;  %v2267_v41 = vsub.f32 %v2255_v31, %v2262_v40 }
 0xa81   : > { %v2271_v42 = vmul.f32 1.442695, %v2267_v41 }
 0xa82   : > { %v2265_v43 = vpop.xlane.xlu0 %2264  ;;  %v2295_v57 = vpop.permute.xlu1 %2294 }
 0xa83   : > { %4117 = vpow2.f32 %v2271_v42  ;;  %v2268_v45 = vsub.f32 %v2256_v35, %v2265_v43 }
 0xa85   : > { %v2273_v47 = vmul.f32 1.442695, %v2268_v45 }
 0xa86   : > { %v4052_v62 = vpop.permute.xlu1 %4051 }
 0xa87   : > { %4119 = vpow2.f32 %v2273_v47  ;;  %v4054_v9 = vunpack.i.h.bf16 %v4052_v62  ;;  %v4053_v10 = vunpack.i.l.bf16 %v4052_v62 }
 0xa89   : > { %v4116_v48 = vpop.eup %4115  ;;  %v3959_v13 = vpack.c.bf16 %v4054_v9, %v4053_v10 }
 0xa8a   : > { %v2275_v49 = vsel %vm1594_vm9, %v4116_v48, 0.0  ;;  %v2492_v0 = vpop.permute.xlu1 %2491 }
 0xa8b   : > { %2276 = vadd.xlane.f32.xlu0 %v2275_v49 }
 0xa8d   : > { %v4118_v53 = vpop.eup %4117 }
 0xa8e   : > { %v2278_v54 = vsel %vm1594_vm9, %v4118_v53, 0.0 }
 0xa8f   : > { %2279 = vadd.xlane.f32.xlu0 %v2278_v54 }
 0xa91   : > { %v4120_v55 = vpop.eup %4119 }
 0xa92   : > { %v2281_v58 = vsel %vm1594_vm9, %v4120_v55, 0.0 }
 0xa93   : > { %2282 = vadd.xlane.f32.xlu1 %v2281_v58 }
 0xaa4   : > { %2483 = vrot.lane.b32.xlu1 %v4637_v51, %s4232_s0 }
 0xaa5   : > { %4046 = vrot.lane.b32.xlu0 %v4641_v52, %s4230_s7  ;;  %s4234_s7 = smov [#allocation3]  }
 0xaa9   : > { %2481 = vrot.lane.b32.xlu0 %v4635_v50, %s4232_s0 }
 0xaad   : > { %2485 = vrot.lane.b32.xlu0 %v4632_v46, %s4232_s0 }
 0xb18   : > { %v2277_v59 = vpop.xlane.xlu0 %2276 }
 0xb19   : > { %4121 = vrcp.f32 %v2277_v59 }
 0xb1c   : > { %v2280_v2 = vpop.xlane.xlu0 %2279 }
 0xb1d   : > { %4123 = vrcp.f32 %v2280_v2 }
 0xb20   : > { %v2283_v3 = vpop.xlane.xlu1 %2282  ;;  %v4047_v4 = vpop.permute.xlu0 %4046 }
 0xb21   : > { %v4049_v5 = vunpack.i.h.bf16 %v4047_v4  ;;  %v4048_v6 = vunpack.i.l.bf16 %v4047_v4  ;;  %4125 = vrcp.f32 %v2283_v3 }
 0xb23   : > { %v3956_v7 = vpack.c.bf16 %v4049_v5, %v4048_v6  ;;  %v4122_v51 = vpop.eup %4121  ;;  %v2722_v6 = vld [vmem:[%s5119_s12 + $0x18] sm:$0xff]  ;;  %s4160_s12 = sshll.u32 %s4234_s7, 4  ;;  %s4161_s12 = int_to_ptr.vmem [resolvable:$false] %s4160_s12 }
 0xb24   : > { %v2287_v50 = vmul.f32 %v4122_v51, %v4116_v48  ;;  %v2482_v16 = vpop.permute.xlu0 %2481  ;;  %v2484_v56 = vpop.permute.xlu1 %2483  ;;  %s4162_s0 = scalar_lea.vmem %s4161_s12, 32  ;;  %p4163_p0 = scmp.lt.s32.totalorder %s5010_s6, %s4161_s12 }
 0xb25   : > { %3957 = vmatpush3.bf16.msra.mxu0 %v3956_v7 }
 0xb26   : > { %3822 = vmatprep.subr.mxu0 %v4220_v22 }
 0xb27   : > { %v4124_v8 = vpop.eup %4123 }
 0xb28   : > { %v2288_v11 = vmul.f32 %v4124_v8, %v4118_v53  ;;  %v2486_v61 = vpop.permute.xlu0 %2485 }
 0xb29   : > { %3823 = vmatpush3.msra.mxu0 %v2295_v57 }
 0xb2a   : > { %3825 = vmatmul.mubr.msk.f32.vlgmr.msra.gmra.mrb[38].mxu0 %vm1594_vm9, %v2287_v50  ;;  %3958 = vmatprep.subr.bf16.mxu0 %v4222_v44 }
 0xb2b   : > { %3827 = vmatprep.mubr.msk.f32.mxu0 %vm4221_vm2, %v4220_v22  ;;  %v4126_v12 = vpop.eup %4125 }
 0xb2c   : > { %v2289_v14 = vmul.f32 %v4126_v12, %v4120_v55 }
 0xb2e   : > { %3828 = vmatmul.mubr.msk.f32.gmra.mrb[40].mxu0 %vm1594_vm9, %v2288_v11 }
 0xb2f   : > { %3830 = vmatprep.mubr.msk.f32.mxu0 %vm4221_vm2, %v4220_v22 }
 0xb30   : > { %3961 = vmatpush3.bf16.xpose.msk.msra.mxu0 %vm4646_vm7, %v3959_v13 }
 0xb31   : > { %3848 = vmatprep.subr.mxu0 %v4220_v22 }
 0xb32   : > { %3831 = vmatmul.mubr.msk.f32.gmra.mrb[42].mxu0 %vm1594_vm9, %v2289_v14 }
 0xb33   : > { %3850 = vmatprep.mubr.msk.f32.mxu0 %vm4221_vm2, %v4220_v22 }
 0xb38   : > { %3849 = vmatpush3.xpose.msk.msra.mxu0 %vm1495_vm6, %v2492_v0 }
 0xb39   : > { %3874 = vmatprep.subr.mxu0 %v4220_v22 }
 0xb3b   : > { %3851 = vmatmul.mubr.msk.f32.vlgmr.msra.gmra.mrb[44].mxu0 %vm1495_vm6, %v2482_v16 }
 0xb3c   : > { %3853 = vmatprep.mubr.msk.f32.mxu0 %vm4221_vm2, %v4220_v22  ;;  %3875 = vmatpush3.msra.mxu0 %v2722_v6  ;;  %v4070_v6 = vld [vmem:[%s5066_s16 + $0x8] sm:$0xff]  }
 0xb3f   : > { %3854 = vmatmul.mubr.msk.f32.gmra.mrb[46].mxu0 %vm1495_vm6, %v2484_v56 }
 0xb40   : > { %3856 = vmatprep.mubr.msk.f32.mxu0 %vm4221_vm2, %v4220_v22 }
 0xb43   : > { %3857 = vmatmul.mubr.msk.f32.gmra.mrb[48].mxu0 %vm1495_vm6, %v2486_v61 }
 0xb44   : > { %3876 = vmatprep.mubr.msk.f32.mxu0 %vm4221_vm2, %v4220_v22 }
 0xbfd   : > { %v2374_v19 = vpop.f32.mrb[38].mxu0 }
 0xbfe   : > { %v3826_v21 = vpop.f32.mrb[39].mxu0  ;;  %3836 = vmatmul.mubr.msk.f32.vlgmr.msra.gmra.mrb[44].mxu1 %vm1495_vm6, %v2374_v19 }
 0xbff   : > { %3838 = vmatprep.mubr.msk.f32.mxu1 %vm4221_vm2, %v4220_v22 }
 0xc01   : > { %v2379_v23 = vpop.f32.mrb[40].mxu0 }
 0xc02   : > { %v3829_v24 = vpop.f32.mrb[41].mxu0  ;;  %3839 = vmatmul.mubr.msk.f32.gmra.mrb[46].mxu1 %vm1495_vm6, %v2379_v23 }
 0xc03   : > { %3841 = vmatprep.mubr.msk.f32.mxu1 %vm4221_vm2, %v4220_v22 }
 0xc05   : > { %v2384_v25 = vpop.f32.mrb[42].mxu0 }
 0xc06   : > { %v3832_v26 = vpop.f32.mrb[43].mxu0  ;;  %3842 = vmatmul.mubr.msk.f32.gmra.mrb[48].mxu1 %vm1495_vm6, %v2384_v25 }
 0xc07   : > { %3865 = vmatprep.mubr.msk.f32.mxu1 %vm4221_vm2, %v4220_v22 }
 0xc0e   : > { %v2571_v44 = vpop.f32.mrb[44].mxu0 }
 0xc0f   : > { %v2585_v27 = vmul.f32 0.35355338, %v2571_v44  ;;  %v3852_v28 = vpop.f32.mrb[45].mxu0 }
 0xc10   : > { %v4153_v28 = vld [vmem:[#allocation2] sm:$0xff] }
 0xc11   : > { %v2588_v29 = vsel %vm1485_vm8, %v2585_v27, -1e+30  ;;  %v3504_v27 = vld [vmem:[%s5063_s13] ss:$0 sm:$0xff] }
 0xc12   : > { %v2576_v30 = vpop.f32.mrb[46].mxu0  ;;  %v2591_v31 = vsel %vm1594_vm9, %v2588_v29, -inf }
 0xc13   : > { %v2586_v63 = vmul.f32 0.35355338, %v2576_v30  ;;  %2592 = vmax.xlane.f32.xlu1 %v2591_v31  ;;  %v3855_v32 = vpop.f32.mrb[47].mxu0 }
 0xc15   : > { %v2589_v33 = vsel %vm1485_vm8, %v2586_v63, -1e+30 }
 0xc16   : > { %v2581_v34 = vpop.f32.mrb[48].mxu0  ;;  %v2594_v35 = vsel %vm1594_vm9, %v2589_v33, -inf }
 0xc17   : > { %v2587_v36 = vmul.f32 0.35355338, %v2581_v34  ;;  %2595 = vmax.xlane.f32.xlu0 %v2594_v35  ;;  %v3858_v37 = vpop.f32.mrb[49].mxu0 }
 0xc19   : > { %v2590_v38 = vsel %vm1485_vm8, %v2587_v36, -1e+30 }
 0xc1a   : > { %v2597_v39 = vsel %vm1594_vm9, %v2590_v38, -inf }
 0xc1b   : > { %2598 = vmax.xlane.f32.xlu0 %v2597_v39 }
 0xca0   : > { %v2593_v40 = vpop.xlane.xlu1 %2592 }
 0xca1   : > { %v2600_v41 = vsub.f32 %v2588_v29, %v2593_v40  ;;  %v4155_v40 = vld [vmem:[#allocation2 + $0x10] sm:$0xff] }
 0xca3   : > { %v2603_v42 = vmul.f32 1.442695, %v2600_v41 }
 0xca4   : > { %v2596_v43 = vpop.xlane.xlu0 %2595 }
 0xca5   : > { %4127 = vpow2.f32 %v2603_v42  ;;  %v2601_v45 = vsub.f32 %v2589_v33, %v2596_v43  ;;  %v4154_v33 = vld [vmem:[#allocation2 + $0x8] sm:$0xff] }
 0xca7   : > { %v2605_v47 = vmul.f32 1.442695, %v2601_v45 }
 0xca8   : > { %v2599_v48 = vpop.xlane.xlu0 %2598 }
 0xca9   : > { %4129 = vpow2.f32 %v2605_v47  ;;  %v2602_v49 = vsub.f32 %v2590_v38, %v2599_v48 }
 0xcab   : > { %v2607_v53 = vmul.f32 1.442695, %v2602_v49 }
 0xcad   : > { %4131 = vpow2.f32 %v2607_v53 }
 0xcaf   : > { %v4128_v54 = vpop.eup %4127 }
 0xcb0   : > { %v2609_v55 = vsel %vm1594_vm9, %v4128_v54, 0.0 }
 0xcb1   : > { %2610 = vadd.xlane.f32.xlu0 %v2609_v55 }
 0xcb3   : > { %v4130_v60 = vpop.eup %4129 }
 0xcb4   : > { %v2612_v58 = vsel %vm1594_vm9, %v4130_v60, 0.0 }
 0xcb5   : > { %2613 = vadd.xlane.f32.xlu1 %v2612_v58 }
 0xcb7   : > { %v4132_v57 = vpop.eup %4131 }
 0xcb8   : > { %v2615_v62 = vsel %vm1594_vm9, %v4132_v57, 0.0 }
 0xcb9   : > { %2616 = vadd.xlane.f32.xlu0 %v2615_v62 }
 0xcc6   : > { %4056 = vrot.lane.b32.xlu1 %v4641_v52, %s4233_s10 }
 0xccf   : > { %2628 = vrot.lane.b32.xlu0 %v4632_v46, %s4233_s10  ;;  %s4156_s10 = scalar_lea.vmem %s5010_s6, 16 }
 0xcd0   : > { %p4157_p11 = scmp.ne.s32.totalorder %s5010_s6, %s4156_s10  ;;  %p4164_p1 = scmp.lt.s32.totalorder %s4162_s0, %s4156_s10 }
 0xcd1   : > { %v2464_v59 = vpop.f32.mrb[44].mxu1 }
 0xcd2   : > { %v2478_v0 = vadd.f32 %v2464_v59, %v4793_v15  ;;  %v3837_v2 = vpop.f32.mrb[45].mxu1  ;;  %p4158_p12 = pnand %p4157_p11, %p4408_p5  ;;  %p4165_p2 = por %p4164_p1, %p4163_p0 }
 0xcd4   : > { %p4159_p13 = pneg %p4158_p12 }
 0xcd5   : > { %v2469_v3 = vpop.f32.mrb[46].mxu1 }
 0xcd6   : > { %v2479_v4 = vadd.f32 %v2469_v3, %v4795_v17  ;;  %v3840_v5 = vpop.f32.mrb[47].mxu1  ;;  %p4166_p3 = pnand %p4165_p2, %p4159_p13 }
 0xcd7   : > { %v4069_v5 = vld [vmem:[%s5066_s16] sm:$0xff]  }
 0xcd9   : > { %v2474_v7 = vpop.f32.mrb[48].mxu1 }
 0xcda   : > { %v2480_v51 = vadd.f32 %v2474_v7, %v4797_v20  ;;  %v3843_v50 = vpop.f32.mrb[49].mxu1 }
 0xd3e   : > { %v2611_v52 = vpop.xlane.xlu0 %2610 }
 0xd3f   : > { %4133 = vrcp.f32 %v2611_v52 }
 0xd42   : > { %v2614_v46 = vpop.xlane.xlu1 %2613 }
 0xd43   : > { %4135 = vrcp.f32 %v2614_v46 }
 0xd46   : > { %v4057_v8 = vpop.permute.xlu1 %4056  ;;  %v2617_v15 = vpop.xlane.xlu0 %2616 }
 0xd47   : > { %v4059_v9 = vunpack.i.h.bf16 %v4057_v8  ;;  %v4058_v10 = vunpack.i.l.bf16 %v4057_v8  ;;  %4137 = vrcp.f32 %v2617_v15 }
 0xd49   : > { %v3963_v11 = vpack.c.bf16 %v4059_v9, %v4058_v10  ;;  %v4134_v17 = vpop.eup %4133 }
 0xd4a   : > { %v2621_v12 = vmul.f32 %v4134_v17, %v4128_v54  ;;  %v2629_v13 = vpop.permute.xlu0 %2628 }
 0xd4b   : > { %3964 = vmatpush3.bf16.msra.mxu1 %v3963_v11 }
 0xd4c   : > { %3863 = vmatprep.subr.mxu1 %v4220_v22 }
 0xd4d   : > { %v4136_v14 = vpop.eup %4135 }
 0xd4e   : > { %v2622_v20 = vmul.f32 %v4136_v14, %v4130_v60 }
 0xd4f   : > { %3864 = vmatpush3.msra.mxu1 %v2629_v13 }
 0xd50   : > { %3866 = vmatmul.mubr.msk.f32.vlgmr.msra.gmra.mrb[50].mxu1 %vm1594_vm9, %v2621_v12  ;;  %3885 = vmatprep.subr.bf16.mxu1 %v4069_v5  ;;  %v3505_v12 = vld [vmem:[%s5064_s14] ss:$0 sm:$0xff] }
 0xd51   : > { %3868 = vmatprep.mubr.msk.f32.mxu1 %vm4221_vm2, %v4220_v22  ;;  %v4138_v16 = vpop.eup %4137  ;;  %3886 = vmatpush3.bf16.msra.mxu1 %v4069_v5 }
 0xd52   : > { %v2623_v56 = vmul.f32 %v4138_v16, %v4132_v57  ;;  %3887 = vmatprep.subr.bf16.mxu1 %v4070_v6  ;;  %v3506_v16 = vld [vmem:[%s5065_s15] ss:$0 sm:$0xff] }
 0xd54   : > { %3869 = vmatmul.mubr.msk.f32.gmra.mrb[52].mxu1 %vm1594_vm9, %v2622_v20 }
 0xd55   : > { %3871 = vmatprep.mubr.msk.f32.mxu1 %vm4221_vm2, %v4220_v22  ;;  %3888 = vmatpush3.bf16.msra.mxu1 %v4070_v6 }
 0xd56   : > { %3905 = vmatprep.subr.bf16.mxu1 %v4220_v22 }
 0xd58   : > { %3872 = vmatmul.mubr.msk.f32.gmra.mrb[54].mxu1 %vm1594_vm9, %v2623_v56 }
 0xe23   : > { %v2708_v61 = vpop.f32.mrb[50].mxu1 }
 0xe24   : > { %v3867_v18 = vpop.f32.mrb[51].mxu1  ;;  %3877 = vmatmul.mubr.msk.f32.vlgmr.msra.gmra.mrb[50].mxu0 %vm1495_vm6, %v2708_v61 }
 0xe25   : > { %3879 = vmatprep.mubr.msk.f32.mxu0 %vm4221_vm2, %v4220_v22 }
 0xe27   : > { %v2713_v19 = vpop.f32.mrb[52].mxu1 }
 0xe28   : > { %v3870_v21 = vpop.f32.mrb[53].mxu1  ;;  %3880 = vmatmul.mubr.msk.f32.gmra.mrb[52].mxu0 %vm1495_vm6, %v2713_v19 }
 0xe29   : > { %3882 = vmatprep.mubr.msk.f32.mxu0 %vm4221_vm2, %v4220_v22 }
 0xe2b   : > { %v2718_v23 = vpop.f32.mrb[54].mxu1 }
 0xe2c   : > { %v3873_v24 = vpop.f32.mrb[55].mxu1  ;;  %3883 = vmatmul.mubr.msk.f32.gmra.mrb[54].mxu0 %vm1495_vm6, %v2718_v23 }
 0xef7   : > { %v2798_v25 = vpop.f32.mrb[50].mxu0 }
 0xef8   : > { %v2812_v26 = vadd.f32 %v2798_v25, %v2478_v0  ;;  %v3878_v44 = vpop.f32.mrb[51].mxu0 }
 0xef9   : > { %v4071_v44 = vld [vmem:[%s5068_s18] sm:$0xff]  }
 0xefa   : > { %v2815_v29 = vadd.f32 %v4153_v28, %v2812_v26  ;;  %3893 = vmatprep.subr.bf16.mxu0 %v4071_v44  ;;  %v4073_v28 = vld [vmem:[%s5068_s18 + $0x10] sm:$0xff]  }
 0xefb   : > { %v2803_v30 = vpop.f32.mrb[52].mxu0  ;;  %3894 = vmatpush3.bf16.msra.mxu0 %v4071_v44 }
 0xefc   : > { %v2813_v31 = vadd.f32 %v2803_v30, %v2479_v4  ;;  %v3881_v63 = vpop.f32.mrb[53].mxu0  ;;  %v2825_v32 = vadd.f32 %v3504_v27, %v2815_v29  ;;  %v4074_v29 = vld [vmem:[%s5068_s18 + $0x18] sm:$0xff]   ;;  %v3507_v30 = vld [vmem:[%s5067_s17] ss:$0 sm:$0xff] }
 0xefe   : > { %v2816_v34 = vadd.f32 %v4154_v33, %v2813_v31  ;;  %v2828_v35 = vsel %vm1328_vm4, %v2825_v32, 0.0 }
 0xeff   : > { %2829 = vadd.xlane.f32.xlu1 %v2828_v35  ;;  %v2808_v36 = vpop.f32.mrb[54].mxu0 }
 0xf00   : > { %v2814_v37 = vadd.f32 %v2808_v36, %v2480_v51  ;;  %v3884_v38 = vpop.f32.mrb[55].mxu0  ;;  %v2826_v39 = vadd.f32 %v3504_v27, %v2816_v34 }
 0xf02   : > { %v2817_v41 = vadd.f32 %v4155_v40, %v2814_v37  ;;  %v2831_v42 = vsel %vm1328_vm4, %v2826_v39, 0.0 }
 0xf03   : > { %2832 = vadd.xlane.f32.xlu0 %v2831_v42 }
 0xf04   : > { %v4896_v43 = vadd.f32 %v3504_v27, %v2817_v41  ;;  %v4072_v27 = vld [vmem:[%s5068_s18 + $0x8] sm:$0xff]  }
 0xf05   : > { %3895 = vmatprep.subr.bf16.mxu0 %v4072_v27 }
 0xf06   : > { %v2834_v45 = vsel %vm1328_vm4, %v4896_v43, 0.0  ;;  %3896 = vmatpush3.bf16.msra.mxu0 %v4072_v27 }
 0xf07   : > { %2835 = vadd.xlane.f32.xlu1 %v2834_v45  ;;  %3897 = vmatprep.subr.bf16.mxu0 %v4073_v28 }
 0xf0a   : > { %3898 = vmatpush3.bf16.msra.mxu0 %v4073_v28  ;;  %v4080_v28 = vld [vmem:[%s5072_s22 + $0x28] sm:$0xff]  }
 0xf0b   : > { %3899 = vmatprep.subr.bf16.mxu0 %v4074_v29 }
 0xf0e   : > { %3900 = vmatpush3.bf16.msra.mxu0 %v4074_v29 }
 0xf0f   : > { %3913 = vmatprep.subr.bf16.mxu0 %v4220_v22 }
 0xf8c   : > { %v2830_v47 = vpop.xlane.xlu1 %2829 }
 0xf8d   : > { %v2837_v48 = vmul.f32 0.03125, %v2830_v47 }
 0xf8f   : > { %v2840_v49 = vsub.f32 %v2825_v32, %v2837_v48 }
 0xf90   : > { %v2833_v53 = vpop.xlane.xlu0 %2832 }
 0xf91   : > { %v2838_v54 = vmul.f32 0.03125, %v2833_v53  ;;  %v2843_v55 = vmul.f32 %v2840_v49, %v2840_v49 }
 0xf93   : > { %v2841_v60 = vsub.f32 %v2826_v39, %v2838_v54  ;;  %v2846_v58 = vsel %vm1328_vm4, %v2843_v55, 0.0 }
 0xf94   : > { %2847 = vadd.xlane.f32.xlu0 %v2846_v58  ;;  %v2836_v57 = vpop.xlane.xlu1 %2835 }
 0xf95   : > { %v2839_v62 = vmul.f32 0.03125, %v2836_v57  ;;  %v2844_v59 = vmul.f32 %v2841_v60, %v2841_v60 }
 0xf97   : > { %v2842_v0 = vsub.f32 %v4896_v43, %v2839_v62  ;;  %v2849_v2 = vsel %vm1328_vm4, %v2844_v59, 0.0 }
 0xf98   : > { %2850 = vadd.xlane.f32.xlu1 %v2849_v2 }
 0xf99   : > { %v2845_v3 = vmul.f32 %v2842_v0, %v2842_v0 }
 0xf9b   : > { %v2852_v4 = vsel %vm1328_vm4, %v2845_v3, 0.0 }
 0xf9c   : > { %2853 = vadd.xlane.f32.xlu0 %v2852_v4 }
0x1021   : > { %v2848_v7 = vpop.xlane.xlu0 %2847 }
0x1022   : > { %v2855_v51 = vmul.f32 0.03125, %v2848_v7 }
0x1024   : > { %v2858_v50 = vadd.f32 1e-06, %v2855_v51 }
0x1025   : > { %v2851_v52 = vpop.xlane.xlu1 %2850 }
0x1026   : > { %4139 = vrsqrt.f32 %v2858_v50  ;;  %v2856_v46 = vmul.f32 0.03125, %v2851_v52 }
0x1028   : > { %v2859_v8 = vadd.f32 1e-06, %v2856_v46  ;;  %v4075_v46 = vld [vmem:[%s5072_s22] sm:$0xff]  }
0x1029   : > { %v2854_v15 = vpop.xlane.xlu0 %2853 }
0x102a   : > { %4141 = vrsqrt.f32 %v2859_v8  ;;  %v2857_v9 = vmul.f32 0.03125, %v2854_v15  ;;  %v4076_v15 = vld [vmem:[%s5072_s22 + $0x8] sm:$0xff]  }
0x102c   : > { %v2860_v10 = vadd.f32 1e-06, %v2857_v9  ;;  %v4077_v9 = vld [vmem:[%s5072_s22 + $0x10] sm:$0xff]  }
0x102e   : > { %4143 = vrsqrt.f32 %v2860_v10  ;;  %v4078_v10 = vld [vmem:[%s5072_s22 + $0x18] sm:$0xff]  }
0x1030   : > { %v4140_v11 = vpop.eup %4139 }
0x1031   : > { %v2864_v17 = vmul.f32 %v4140_v11, %v2840_v49  ;;  %v1241_v11 = vmul.f32 0.00390625, %v4605_v1 }
0x1033   : > { %v2874_v20 = vmul.f32 %v3505_v12, %v2864_v17  ;;  %v3125_v17 = vpack.c.bf16 %v1241_v11, %v1241_v11 }
0x1034   : > { %v4142_v13 = vpop.eup %4141 }
0x1035   : > { %v2865_v14 = vmul.f32 %v4142_v13, %v2841_v60  ;;  %v2884_v19 = vadd.f32 %v3506_v16, %v2874_v20  ;;  %v3518_v13 = vld [vmem:[%s5069_s19] ss:$0 sm:$0xff] }
0x1037   : > { %v2875_v56 = vmul.f32 %v3505_v12, %v2865_v14 }
0x1038   : > { %v4144_v61 = vpop.eup %4143 }
0x1039   : > { %v2866_v18 = vmul.f32 %v4144_v61, %v2842_v0  ;;  %v2885_v21 = vadd.f32 %v3506_v16, %v2875_v56 }
0x103b   : > { %v2876_v23 = vmul.f32 %v3505_v12, %v2866_v18  ;;  %v2891_v24 = vpack.c.bf16 %v2885_v21, %v2884_v19 }
0x103d   : > { %v2886_v25 = vadd.f32 %v3506_v16, %v2876_v23  ;;  %3889 = vmatprep.mubr.msk.bf16.mxu1 %vm1328_vm4, %v2891_v24 }
0x103f   : > { %v2892_v26 = vpack.c.bf16 %v2886_v25, %v2886_v25 }
0x1041   : > { %3890 = vmatmul.mubr.msk.bf16.vlgmr.msra.gmra.mrb[56].mxu1 %vm1328_vm4, %v2892_v26 }
0x1042   : > { %3909 = vmatprep.mubr.msk.bf16.mxu1 %vm4221_vm2, %v4220_v22 }
0x1114   : > { %v3891_v31 = vpop.f32.mrb[56].mxu1 }
0x1115   : > { %v2961_v63 = vadd.f32 %v3891_v31, %v3507_v30  ;;  %v2952_v32 = vpop.f32.mrb[57].mxu1 }
0x1116   : > { %v2953_v33 = vadd.f32 %v3507_v30, %v2952_v32  ;;  %v3892_v34 = vpop.f32.mrb[58].mxu1  ;;  %v3519_v32 = vld [vmem:[%s5070_s20] ss:$0 sm:$0xff] }
0x1117   : > { %v2968_v35 = vmul.f32 %v2961_v63, %v2961_v63  ;;  %v2955_v36 = vpop.f32.mrb[59].mxu1  ;;  %v3520_v34 = vld [vmem:[%s5071_s21] ss:$0 sm:$0xff] }
0x1118   : > { %v2966_v37 = vmul.f32 %v2953_v33, %v2953_v33  ;;  %v2956_v38 = vadd.f32 %v3507_v30, %v2955_v36 }
0x1119   : > { %v2971_v39 = vmul.f32 %v2968_v35, %v2961_v63 }
0x111a   : > { %v2969_v40 = vmul.f32 %v2966_v37, %v2953_v33  ;;  %v2967_v41 = vmul.f32 %v2956_v38, %v2956_v38  ;;  %v4081_v37 = vld [vmem:[%s5074_s24] sm:$0xff]  }
0x111b   : > { %v2974_v42 = vmul.f32 0.044715, %v2971_v39  ;;  %v4082_v39 = vld [vmem:[%s5074_s24 + $0x8] sm:$0xff]  }
0x111c   : > { %v2972_v45 = vmul.f32 0.044715, %v2969_v40  ;;  %v2970_v47 = vmul.f32 %v2967_v41, %v2956_v38  ;;  %v4083_v40 = vld [vmem:[%s5074_s24 + $0x10] sm:$0xff]   ;;  %v4084_v41 = vld [vmem:[%s5074_s24 + $0x18] sm:$0xff]  }
0x111d   : > { %v2977_v48 = vadd.f32 %v2974_v42, %v2961_v63 }
0x111e   : > { %v2975_v49 = vadd.f32 %v2972_v45, %v2953_v33  ;;  %v2973_v53 = vmul.f32 0.044715, %v2970_v47  ;;  %v3253_v45 = vld [vmem:[%s5073_s23] sm:$0x1] }
0x111f   : > { %v2980_v54 = vmul.f32 0.7978846, %v2977_v48 }
0x1120   : > { %v2978_v55 = vmul.f32 0.7978846, %v2975_v49  ;;  %v2976_v60 = vadd.f32 %v2973_v53, %v2956_v38 }
0x1121   : > { %4145 = vtanh.f32 %v2980_v54 }
0x1122   : > { %4147 = vtanh.f32 %v2978_v55  ;;  %v2979_v58 = vmul.f32 0.7978846, %v2976_v60 }
0x1124   : > { %4149 = vtanh.f32 %v2979_v58 }
0x112b   : > { %v4146_v57 = vpop.eup %4145 }
0x112c   : > { %v4148_v62 = vpop.eup %4147  ;;  %v2986_v59 = vadd.f32 1.0, %v4146_v57 }
0x112d   : > { %v2984_v0 = vadd.f32 1.0, %v4148_v62 }
0x112e   : > { %v4150_v2 = vpop.eup %4149  ;;  %v2989_v3 = vmul.f32 0.5, %v2986_v59 }
0x112f   : > { %v2987_v4 = vmul.f32 0.5, %v2984_v0  ;;  %v2985_v5 = vadd.f32 1.0, %v4150_v2 }
0x1130   : > { %v2992_v7 = vmul.f32 %v2989_v3, %v2961_v63 }
0x1131   : > { %v2988_v6 = vmul.f32 0.5, %v2985_v5  ;;  %v2990_v51 = vmul.f32 %v2987_v4, %v2953_v33 }
0x1132   : > { %v3002_v8 = vpack.c.bf16 %v2992_v7, %v2992_v7 }
0x1133   : > { %v2991_v50 = vmul.f32 %v2988_v6, %v2956_v38 }
0x1135   : > { %v3001_v52 = vpack.c.bf16 %v2991_v50, %v2990_v51 }
0x1137   : > { %3901 = vmatprep.mubr.msk.bf16.mxu0 %vm1003_vm3, %v3001_v52 }
0x1138   : > { %3902 = vmatmul.mubr.msk.bf16.vlgmr.msra.gmra.mrb[56].mxu0 %vm1003_vm3, %v3002_v8 }
0x1139   : > { %3914 = vmatpush3.bf16.msra.mxu0 %v4075_v46  ;;  %3921 = vmatprep.mubr.msk.bf16.mxu0 %vm4221_vm2, %v4220_v22 }
0x113a   : > { %3915 = vmatprep.subr.bf16.mxu0 %v4220_v22 }
0x113d   : > { %3916 = vmatpush3.bf16.msra.mxu0 %v4076_v15 }
0x113e   : > { %3917 = vmatprep.subr.bf16.mxu0 %v4220_v22 }
0x1141   : > { %3918 = vmatpush3.bf16.msra.mxu0 %v4077_v9 }
0x1142   : > { %3919 = vmatprep.subr.bf16.mxu0 %v4220_v22 }
0x1145   : > { %3920 = vmatpush3.bf16.msra.mxu0 %v4078_v10 }
0x1148   : > { %3922 = vmatmul.mubr.msk.bf16.vlgmr.msra.gmra.mrb[60].mxu0 %vm1003_vm3, %v3125_v17 }
0x120b   : > { %v3903_v12 = vpop.f32.mrb[56].mxu0 }
0x120c   : > { %v3079_v14 = vadd.f32 %v3903_v12, %v4896_v43  ;;  %v3067_v20 = vpop.f32.mrb[57].mxu0  ;;  %v4079_v43 = vld [vmem:[%s5072_s22 + $0x20] sm:$0xff]  }
0x120d   : > { %v3904_v16 = vpop.f32.mrb[58].mxu0  ;;  %3906 = vmatpush3.bf16.msra.mxu1 %v4079_v43 }
0x120e   : > { %v3069_v56 = vpop.f32.mrb[59].mxu0  ;;  %v3087_v61 = vadd.f32 %v3518_v13, %v3079_v14  ;;  %3907 = vmatprep.subr.bf16.mxu1 %v4220_v22 }
0x1210   : > { %v3088_v18 = vsel %vm1328_vm4, %v3087_v61, 0.0 }
0x1211   : > { %3089 = vadd.xlane.f32.xlu1 %v3088_v18  ;;  %3908 = vmatpush3.bf16.msra.mxu1 %v4080_v28 }
0x1212   : > { %3925 = vmatprep.subr.bf16.mxu1 %v4220_v22 }
0x121b   : > { %v3247_v19 = vpop.f32.mrb[60].mxu0 }
0x121c   : > { %v3923_v1 = vpop.f32.mrb[61].mxu0 }
0x121d   : > { %v3250_v21 = vpop.f32.mrb[62].mxu0 }
0x121e   : > { %v3924_v23 = vpop.f32.mrb[63].mxu0 }
0x129e   : > { %v3090_v24 = vpop.xlane.xlu1 %3089 }
0x129f   : > { %v3091_v25 = vmul.f32 0.03125, %v3090_v24 }
0x12a1   : > { %v3092_v26 = vsub.f32 %v3087_v61, %v3091_v25 }
0x12a3   : > { %v3093_v44 = vmul.f32 %v3092_v26, %v3092_v26 }
0x12a5   : > { %v3094_v27 = vsel %vm1328_vm4, %v3093_v44, 0.0 }
0x12a6   : > { %3095 = vadd.xlane.f32.xlu0 %v3094_v27 }
0x1333   : > { %v3096_v29 = vpop.xlane.xlu0 %3095 }
0x1334   : > { %v3097_v30 = vmul.f32 0.03125, %v3096_v29 }
0x1336   : > { %v3098_v31 = vadd.f32 1e-06, %v3097_v30 }
0x1338   : > { %4151 = vrsqrt.f32 %v3098_v31 }
0x1342   : > { %v4152_v63 = vpop.eup %4151 }
0x1343   : > { %v3100_v33 = vmul.f32 %v4152_v63, %v3092_v26 }
0x1345   : > { %v3108_v35 = vmul.f32 %v3519_v32, %v3100_v33 }
0x1347   : > { %v3116_v36 = vadd.f32 %v3520_v34, %v3108_v35 }
0x1349   : > { %v3130_v38 = vpack.c.bf16 %v3116_v36, %v3116_v36 }
0x134b   : > { %3910 = vmatmul.mubr.msk.bf16.vlgmr.msra.gmra.mrb[60].mxu1 %vm1328_vm4, %v3130_v38 }
0x134c   : > { %3926 = vmatpush3.bf16.msra.mxu1 %v4081_v37  ;;  %3933 = vmatprep.mubr.msk.bf16.mxu1 %vm4221_vm2, %v4220_v22 }
0x134d   : > { %3927 = vmatprep.subr.bf16.mxu1 %v4220_v22 }
0x1350   : > { %3928 = vmatpush3.bf16.msra.mxu1 %v4082_v39 }
0x1351   : > { %3929 = vmatprep.subr.bf16.mxu1 %v4220_v22 }
0x1354   : > { %3930 = vmatpush3.bf16.msra.mxu1 %v4083_v40 }
0x1355   : > { %3931 = vmatprep.subr.bf16.mxu1 %v4220_v22  ;;  %v3265_v22 = vld [vmem:[%s5075_s25] sm:$0x1] }
0x1358   : > { %3932 = vmatpush3.bf16.msra.mxu1 %v4084_v41 }
0x141e   : > { %v3180_v42 = vpop.f32.mrb[60].mxu1 }
0x141f   : > { %v3248_v47 = vadd.f32 %v3247_v19, %v3180_v42  ;;  %v3911_v48 = vpop.f32.mrb[61].mxu1 }
0x1420   : > { %v3183_v49 = vpop.f32.mrb[62].mxu1 }
0x1421   : > { %v3254_v53 = vadd.f32 %v3253_v45, %v3248_v47  ;;  %v3912_v54 = vpop.f32.mrb[63].mxu1 }
0x1423   : > { %v3255_v55 = vmax.f32 %v3254_v53, 0.0 }
0x1425   : > { %v3264_v60 = vpack.c.bf16 %v3255_v55, %v3255_v55 }
0x1427   : > { %3934 = vmatmul.mubr.msk.bf16.vlgmr.msra.gmra.mrb[64].mxu1 %vm1003_vm3, %v3264_v60 }
0x14fa   : > { %v3327_v58 = vpop.f32.mrb[64].mxu1 }
0x14fb   : > { %v3328_v57 = vadd.f32 %v3327_v58, %v3265_v22  ;;  %v3935_v62 = vpop.f32.mrb[65].mxu1 }
0x14fc   : > { %v3330_v59 = vpop.f32.mrb[66].mxu1 }
0x14fd   : > { %v3936_v0 = vpop.f32.mrb[67].mxu1  ;;  %3334 = vst.msk [vmem:[%s798_s9] sm:$0x1] %vm3333_vm10, %v3328_v57 }
0x14fe   : > { %4169 = shalt.err (!%p4166_p3)
}
0x14ff   : > { %s4170_s30 = scalar_lea.hbm %s5008_s11, 16  ;;  %s4174_s4 = scalar_lea.hbm %s5076_s26, 32 }
0x1500   : > { %p4171_p4 = scmp.ne.s32.totalorder %s5008_s11, %s4170_s30  ;;  %p4175_p9 = scmp.lt.u32.totalorder %s5008_s11, %s5076_s26 }
0x1501   : > { %p4176_p10 = scmp.lt.u32.totalorder %s4174_s4, %s4170_s30  ;;  %p4178_p12 = scmp.lt.u32.totalorder %s4170_s30, %s5008_s11 }
0x1502   : > { %p4172_p7 = pnand %p4171_p4, %p4408_p5 }
0x1503   : > { %p4177_p11 = por %p4176_p10, %p4175_p9 }
0x1504   : > { %p4173_p8 = pneg %p4172_p7 }
0x1505   : > { %p4179_p13 = por %p4178_p12, %p4177_p11 }
0x1507   : > { %p4180_p0 = pnand %p4179_p13, %p4173_p8 }
0x1509   : > { %4183 = shalt.err (!%p4180_p0)
}
0x150a   : > { %3967 = dma.vmem_to_hbm [thread:$0]  (%p4408_p5), %s5010_s6, 16, %s5008_s11, %s3336_s8  }
0x150b PF: > { %p3973_p1 = scmp.ge.s32.totalorder %s4218_s28, 2  ;;  %s3360_s10 = sand.u32 1, %s4206_s27  }
0x150c   : > { %s3361_s0 = scalar_lea.sflag [#allocation4], %s3360_s10 }
0x150d   : > { %p3970_p2 = pnand %p3973_p1, %p4412_p6 }
0x150f   : > { %4201 = dma.done.wait (!%p3970_p2), %s3361_s0, 16  }
0x1510   : > { %4203 = vsyncadd (!%p3970_p2), %s3361_s0, 4294967280  ;;  %s5120_s28 = sld [smem:[#allocation7_spill]]  ;;  %s5121_s30 = sld [smem:[#allocation6_spill]] }
0x1511   : > { %s5122_s7 = sld [smem:[#allocation8_spill]]  ;;  %s5123_s27 = smov %s4210_s3 }
0x1516   : > { %p36_p3 = scmp.ge.s32.totalorder %s5120_s28, 4   ;;  %s5124_s3 = smov %s5121_s30 }
0x1518   :  { %38 = sbr.rel (!%p36_p3) target bundleno = 17 (0x11), region = 162 }
0x151f   :  { %3365 = vsyncpa [#allocation4], 1 }
0x1520   :  { %3367 = vsyncpa [#allocation4 + $0x1], 1 }

</bundles_post_ra>
